<compile_context>
chip_gen: v7x
topology: tpu7x:2x2x1
jax: 0.10.0
libtpu: 0.0.40
codegen_flags: <defaults>
</compile_context>

<pallas_src>
import functools

import jax
import jax.numpy as jnp
from jax.experimental import pallas as pl
from jax.experimental.pallas import tpu as pltpu

_PREC = jax.lax.Precision.HIGHEST  # full-f32-accuracy MXU passes (matches ref)
_BN_EPS = 1e-5                     # PyTorch BatchNorm1d default


def _round_up(n, m):
    return ((n + m - 1) // m) * m


def _fold_bn(bn):
    """Fold inference-mode BatchNorm1d into per-feature (scale, bias)."""
    scale = bn["gamma"] * jax.lax.rsqrt(bn["var"] + _BN_EPS)
    bias = bn["beta"] - bn["mean"] * scale
    return scale, bias


def _fraud_mlp_kernel(x_ref,
                      w1_ref, s1_ref, c1_ref,
                      w2_ref, s2_ref, c2_ref,
                      w3_ref, s3_ref, c3_ref,
                      wo_ref, bo_ref,
                      o_ref):
    x = x_ref[...]  # (tb, f_pad) f32

    # Layer 1: Linear(30->128, no bias) + folded BN + tanh
    h = jnp.dot(x, w1_ref[...], precision=_PREC,
                preferred_element_type=jnp.float32)
    h = jnp.tanh(h * s1_ref[...] + c1_ref[...])
    # TODO(synk): nn.Dropout(0.5) is identity at inference; training-mode RNG
    # dropout (and batch-statistics BatchNorm) are not implemented here.

    # Layer 2: Linear(128->128, no bias) + folded BN + tanh
    h = jnp.dot(h, w2_ref[...], precision=_PREC,
                preferred_element_type=jnp.float32)
    h = jnp.tanh(h * s2_ref[...] + c2_ref[...])

    # Layer 3: Linear(128->16, no bias) + folded BN + tanh
    h = jnp.dot(h, w3_ref[...], precision=_PREC,
                preferred_element_type=jnp.float32)
    h = jnp.tanh(h * s3_ref[...] + c3_ref[...])

    # Output layer: Linear(16->1) done as multiply + lane reduction.
    y = jnp.sum(h * wo_ref[...], axis=-1, keepdims=True) + bo_ref[...]
    o_ref[...] = y.astype(o_ref.dtype)


@functools.partial(jax.jit, static_argnames=("block_b",))
def fraud_detection_forward(x, params, *, block_b=512):
    """Pallas forward pass of FraudDetectionNN (inference mode)."""
    B, f_in = x.shape

    # --- parameter-only preprocessing (cheap, one-time per call) ---
    s1, c1 = _fold_bn(params["bn1"])
    s2, c2 = _fold_bn(params["bn2"])
    s3, c3 = _fold_bn(params["bn3"])

    # nn.Linear stores (out, in); transpose once so the kernel does x @ W.
    w1 = params["w1"].T.astype(jnp.float32)   # (30, 128)
    w2 = params["w2"].T.astype(jnp.float32)   # (128, 128)
    w3 = params["w3"].T.astype(jnp.float32)   # (128, 16)
    wo = params["wo"].astype(jnp.float32)     # (1, 16)  -- used as a row vector
    bo = params["bo"].reshape(1, 1).astype(jnp.float32)

    # Pad the contraction dim of layer 1 to a sublane multiple (30 -> 32).
    f_pad = _round_up(f_in, 8)
    if f_pad != f_in:
        w1 = jnp.pad(w1, ((0, f_pad - f_in), (0, 0)))

    s1 = s1.reshape(1, -1).astype(jnp.float32)
    c1 = c1.reshape(1, -1).astype(jnp.float32)
    s2 = s2.reshape(1, -1).astype(jnp.float32)
    c2 = c2.reshape(1, -1).astype(jnp.float32)
    s3 = s3.reshape(1, -1).astype(jnp.float32)
    c3 = c3.reshape(1, -1).astype(jnp.float32)

    # --- batch tiling: large blocks, pad only the final partial tile ---
    tb = min(block_b, _round_up(B, 8))
    b_pad = _round_up(B, tb)
    xp = x.astype(jnp.float32)
    if (b_pad, f_pad) != (B, f_in):
        xp = jnp.pad(xp, ((0, b_pad - B), (0, f_pad - f_in)))

    grid = (b_pad // tb,)

    def _rep(arr):  # full-array block, resident across the batch loop
        nd = arr.ndim
        return pl.BlockSpec(arr.shape, lambda i, _n=nd: (0,) * _n)

    in_specs = [
        pl.BlockSpec((tb, f_pad), lambda i: (i, 0)),
        _rep(w1), _rep(s1), _rep(c1),
        _rep(w2), _rep(s2), _rep(c2),
        _rep(w3), _rep(s3), _rep(c3),
        _rep(wo), _rep(bo),
    ]
    out_spec = pl.BlockSpec((tb, 1), lambda i: (i, 0))

    out = pl.pallas_call(
        _fraud_mlp_kernel,
        out_shape=jax.ShapeDtypeStruct((b_pad, 1), jnp.float32),
        grid_spec=pltpu.PrefetchScalarGridSpec(
            num_scalar_prefetch=0,
            grid=grid,
            in_specs=in_specs,
            out_specs=out_spec,
        ),
        compiler_params=pltpu.CompilerParams(
            dimension_semantics=("parallel",)),
    )(xp, w1, s1, c1, w2, s2, c2, w3, s3, c3, wo, bo)

    return out[:B]


def fraud_detection_forward_ref(x, params):
    """Pure-JAX reference with the exact (unfolded) BN inference math."""
    def bn(h, p):
        return (h - p["mean"]) * (p["gamma"] * jax.lax.rsqrt(p["var"] + _BN_EPS)) + p["beta"]

    h = jnp.tanh(bn(jnp.dot(x, params["w1"].T, precision=_PREC), params["bn1"]))
    h = jnp.tanh(bn(jnp.dot(h, params["w2"].T, precision=_PREC), params["bn2"]))
    h = jnp.tanh(bn(jnp.dot(h, params["w3"].T, precision=_PREC), params["bn3"]))
    return jnp.dot(h, params["wo"].T, precision=_PREC) + params["bo"]


if __name__ == "__main__":
    key = jax.random.PRNGKey(0)
    ks = jax.random.split(key, 10)

    B, F_IN, H1, H2, H3 = 64, 30, 128, 128, 16

    def bn_params(k, n):
        kg, kb, km, kv = jax.random.split(k, 4)
        return {
            "gamma": 1.0 + 0.1 * jax.random.normal(kg, (n,), jnp.float32),
            "beta": 0.1 * jax.random.normal(kb, (n,), jnp.float32),
            "mean": 0.1 * jax.random.normal(km, (n,), jnp.float32),
            "var": jax.random.uniform(kv, (n,), jnp.float32,
                                      minval=0.5, maxval=1.5),
        }

    x = jax.random.normal(ks[0], (B, F_IN), dtype=jnp.float32)
    params = {
        # nn.Linear weight layout: (out_features, in_features)
        "w1": jax.random.normal(ks[1], (H1, F_IN), jnp.float32) / jnp.sqrt(F_IN),
        "bn1": bn_params(ks[2], H1),
        "w2": jax.random.normal(ks[3], (H2, H1), jnp.float32) / jnp.sqrt(H1),
        "bn2": bn_params(ks[4], H2),
        "w3": jax.random.normal(ks[5], (H3, H2), jnp.float32) / jnp.sqrt(H2),
        "bn3": bn_params(ks[6], H3),
        "wo": jax.random.normal(ks[7], (1, H3), jnp.float32) / jnp.sqrt(H3),
        "bo": 0.1 * jax.random.normal(ks[8], (1,), jnp.float32),
    }

    out = fraud_detection_forward(x, params)
    out = jax.block_until_ready(out)

    ref = fraud_detection_forward_ref(x, params)
    assert out.shape == (B, 1), out.shape
    max_diff = float(jnp.max(jnp.abs(out - ref)))
    assert jnp.allclose(out, ref, rtol=1e-4, atol=1e-4), ("max_diff", max_diff)

    print("KERNEL_OK")
</pallas_src>

<mosaic_0001>
module attributes {stable_mosaic.version = 11 : i64} {
  func.func @_fraud_mlp_kernel(%arg0: i32, %arg1: memref<64x32xf32, #tpu.memory_space<vmem>>, %arg2: memref<32x128xf32, #tpu.memory_space<vmem>>, %arg3: memref<1x128xf32, #tpu.memory_space<vmem>>, %arg4: memref<1x128xf32, #tpu.memory_space<vmem>>, %arg5: memref<128x128xf32, #tpu.memory_space<vmem>>, %arg6: memref<1x128xf32, #tpu.memory_space<vmem>>, %arg7: memref<1x128xf32, #tpu.memory_space<vmem>>, %arg8: memref<128x16xf32, #tpu.memory_space<vmem>>, %arg9: memref<1x16xf32, #tpu.memory_space<vmem>>, %arg10: memref<1x16xf32, #tpu.memory_space<vmem>>, %arg11: memref<1x16xf32, #tpu.memory_space<vmem>>, %arg12: memref<1x1xf32, #tpu.memory_space<vmem>>, %arg13: memref<64x1xf32, #tpu.memory_space<vmem>>) attributes {dimension_semantics = [#tpu.dimension_semantics<parallel>], iteration_bounds = array<i64: 1>, scalar_prefetch = 0 : i64, scratch_operands = 0 : i64, tpu.core_type = #tpu.core_type<tc>, window_params = [{transform_indices = @transform_0, window_bounds = array<i64: 64, 32>}, {pipeline_mode = #tpu.pipeline_mode<synchronous>, transform_indices = @transform_1, window_bounds = array<i64: 32, 128>}, {pipeline_mode = #tpu.pipeline_mode<synchronous>, transform_indices = @transform_2, window_bounds = array<i64: 1, 128>}, {pipeline_mode = #tpu.pipeline_mode<synchronous>, transform_indices = @transform_3, window_bounds = array<i64: 1, 128>}, {pipeline_mode = #tpu.pipeline_mode<synchronous>, transform_indices = @transform_4, window_bounds = array<i64: 128, 128>}, {pipeline_mode = #tpu.pipeline_mode<synchronous>, transform_indices = @transform_5, window_bounds = array<i64: 1, 128>}, {pipeline_mode = #tpu.pipeline_mode<synchronous>, transform_indices = @transform_6, window_bounds = array<i64: 1, 128>}, {pipeline_mode = #tpu.pipeline_mode<synchronous>, transform_indices = @transform_7, window_bounds = array<i64: 128, 16>}, {pipeline_mode = #tpu.pipeline_mode<synchronous>, transform_indices = @transform_8, window_bounds = array<i64: 1, 16>}, {pipeline_mode = #tpu.pipeline_mode<synchronous>, transform_indices = @transform_9, window_bounds = array<i64: 1, 16>}, {pipeline_mode = #tpu.pipeline_mode<synchronous>, transform_indices = @transform_10, window_bounds = array<i64: 1, 16>}, {pipeline_mode = #tpu.pipeline_mode<synchronous>, transform_indices = @transform_11, window_bounds = array<i64: 1, 1>}, {transform_indices = @transform_12, window_bounds = array<i64: 64, 1>}]} {
    %c0 = arith.constant 0 : index
    %c0_0 = arith.constant 0 : index
    %0 = vector.load %arg1[%c0, %c0_0] : memref<64x32xf32, #tpu.memory_space<vmem>>, vector<64x32xf32>
    %c0_1 = arith.constant 0 : index
    %c0_2 = arith.constant 0 : index
    %1 = vector.load %arg2[%c0_1, %c0_2] : memref<32x128xf32, #tpu.memory_space<vmem>>, vector<32x128xf32>
    %cst = arith.constant dense<0.000000e+00> : vector<64x128xf32>
    %2 = tpu.matmul %0, %1, %cst {dimension_numbers = #tpu.dot_dimension_numbers<[1], [0], [0], [1], [0, 0, 1, 1], [], []>, precision = #tpu.contract_precision<fp32>} : vector<64x32xf32>, vector<32x128xf32>, vector<64x128xf32> -> vector<64x128xf32>
    %c0_3 = arith.constant 0 : index
    %c0_4 = arith.constant 0 : index
    %3 = vector.load %arg3[%c0_3, %c0_4] : memref<1x128xf32, #tpu.memory_space<vmem>>, vector<1x128xf32>
    %4 = vector.broadcast %3 : vector<1x128xf32> to vector<64x128xf32>
    %5 = arith.mulf %2, %4 : vector<64x128xf32>
    %c0_5 = arith.constant 0 : index
    %c0_6 = arith.constant 0 : index
    %6 = vector.load %arg4[%c0_5, %c0_6] : memref<1x128xf32, #tpu.memory_space<vmem>>, vector<1x128xf32>
    %7 = vector.broadcast %6 : vector<1x128xf32> to vector<64x128xf32>
    %8 = arith.addf %5, %7 : vector<64x128xf32>
    %9 = math.tanh %8 : vector<64x128xf32>
    %c0_7 = arith.constant 0 : index
    %c0_8 = arith.constant 0 : index
    %10 = vector.load %arg5[%c0_7, %c0_8] : memref<128x128xf32, #tpu.memory_space<vmem>>, vector<128x128xf32>
    %cst_9 = arith.constant dense<0.000000e+00> : vector<64x128xf32>
    %11 = tpu.matmul %9, %10, %cst_9 {dimension_numbers = #tpu.dot_dimension_numbers<[1], [0], [0], [1], [0, 0, 1, 1], [], []>, precision = #tpu.contract_precision<fp32>} : vector<64x128xf32>, vector<128x128xf32>, vector<64x128xf32> -> vector<64x128xf32>
    %c0_10 = arith.constant 0 : index
    %c0_11 = arith.constant 0 : index
    %12 = vector.load %arg6[%c0_10, %c0_11] : memref<1x128xf32, #tpu.memory_space<vmem>>, vector<1x128xf32>
    %13 = vector.broadcast %12 : vector<1x128xf32> to vector<64x128xf32>
    %14 = arith.mulf %11, %13 : vector<64x128xf32>
    %c0_12 = arith.constant 0 : index
    %c0_13 = arith.constant 0 : index
    %15 = vector.load %arg7[%c0_12, %c0_13] : memref<1x128xf32, #tpu.memory_space<vmem>>, vector<1x128xf32>
    %16 = vector.broadcast %15 : vector<1x128xf32> to vector<64x128xf32>
    %17 = arith.addf %14, %16 : vector<64x128xf32>
    %18 = math.tanh %17 : vector<64x128xf32>
    %c0_14 = arith.constant 0 : index
    %c0_15 = arith.constant 0 : index
    %19 = vector.load %arg8[%c0_14, %c0_15] : memref<128x16xf32, #tpu.memory_space<vmem>>, vector<128x16xf32>
    %cst_16 = arith.constant dense<0.000000e+00> : vector<64x16xf32>
    %20 = tpu.matmul %18, %19, %cst_16 {dimension_numbers = #tpu.dot_dimension_numbers<[1], [0], [0], [1], [0, 0, 1, 1], [], []>, precision = #tpu.contract_precision<fp32>} : vector<64x128xf32>, vector<128x16xf32>, vector<64x16xf32> -> vector<64x16xf32>
    %c0_17 = arith.constant 0 : index
    %c0_18 = arith.constant 0 : index
    %21 = vector.load %arg9[%c0_17, %c0_18] : memref<1x16xf32, #tpu.memory_space<vmem>>, vector<1x16xf32>
    %22 = vector.broadcast %21 : vector<1x16xf32> to vector<64x16xf32>
    %23 = arith.mulf %20, %22 : vector<64x16xf32>
    %c0_19 = arith.constant 0 : index
    %c0_20 = arith.constant 0 : index
    %24 = vector.load %arg10[%c0_19, %c0_20] : memref<1x16xf32, #tpu.memory_space<vmem>>, vector<1x16xf32>
    %25 = vector.broadcast %24 : vector<1x16xf32> to vector<64x16xf32>
    %26 = arith.addf %23, %25 : vector<64x16xf32>
    %27 = math.tanh %26 : vector<64x16xf32>
    %c0_21 = arith.constant 0 : index
    %c0_22 = arith.constant 0 : index
    %28 = vector.load %arg11[%c0_21, %c0_22] : memref<1x16xf32, #tpu.memory_space<vmem>>, vector<1x16xf32>
    %29 = vector.broadcast %28 : vector<1x16xf32> to vector<64x16xf32>
    %30 = arith.mulf %27, %29 : vector<64x16xf32>
    %cst_23 = arith.constant dense<0.000000e+00> : vector<64xf32>
    %31 = vector.multi_reduction <add>, %30, %cst_23 [1] : vector<64x16xf32> to vector<64xf32>
    %32 = vector.shape_cast %31 : vector<64xf32> to vector<64x1xf32>
    %c0_24 = arith.constant 0 : index
    %c0_25 = arith.constant 0 : index
    %33 = vector.load %arg12[%c0_24, %c0_25] : memref<1x1xf32, #tpu.memory_space<vmem>>, vector<1x1xf32>
    %34 = vector.broadcast %33 : vector<1x1xf32> to vector<64x1xf32>
    %35 = arith.addf %32, %34 : vector<64x1xf32>
    %c0_26 = arith.constant 0 : index
    %c0_27 = arith.constant 0 : index
    %36 = vector.load %arg13[%c0_26, %c0_27] : memref<64x1xf32, #tpu.memory_space<vmem>>, vector<64x1xf32>
    tpu.vector_store %arg13[%c0_26, %c0_27], %35 {strides = array<i32>} : memref<64x1xf32, #tpu.memory_space<vmem>>, vector<64x1xf32>,
    return
  }
  func.func @transform_0(%arg0: i32) -> (i32, i32) {
    %c0_i32 = arith.constant 0 : i32
    %c0_i32_0 = arith.constant 0 : i32
    return %arg0, %c0_i32 : i32, i32
  }
  func.func @transform_1(%arg0: i32) -> (i32, i32) {
    %c0_i32 = arith.constant 0 : i32
    %c0_i32_0 = arith.constant 0 : i32
    %c0_i32_1 = arith.constant 0 : i32
    return %c0_i32, %c0_i32_0 : i32, i32
  }
  func.func @transform_2(%arg0: i32) -> (i32, i32) {
    %c0_i32 = arith.constant 0 : i32
    %c0_i32_0 = arith.constant 0 : i32
    %c0_i32_1 = arith.constant 0 : i32
    return %c0_i32, %c0_i32_0 : i32, i32
  }
  func.func @transform_3(%arg0: i32) -> (i32, i32) {
    %c0_i32 = arith.constant 0 : i32
    %c0_i32_0 = arith.constant 0 : i32
    %c0_i32_1 = arith.constant 0 : i32
    return %c0_i32, %c0_i32_0 : i32, i32
  }
  func.func @transform_4(%arg0: i32) -> (i32, i32) {
    %c0_i32 = arith.constant 0 : i32
    %c0_i32_0 = arith.constant 0 : i32
    %c0_i32_1 = arith.constant 0 : i32
    return %c0_i32, %c0_i32_0 : i32, i32
  }
  func.func @transform_5(%arg0: i32) -> (i32, i32) {
    %c0_i32 = arith.constant 0 : i32
    %c0_i32_0 = arith.constant 0 : i32
    %c0_i32_1 = arith.constant 0 : i32
    return %c0_i32, %c0_i32_0 : i32, i32
  }
  func.func @transform_6(%arg0: i32) -> (i32, i32) {
    %c0_i32 = arith.constant 0 : i32
    %c0_i32_0 = arith.constant 0 : i32
    %c0_i32_1 = arith.constant 0 : i32
    return %c0_i32, %c0_i32_0 : i32, i32
  }
  func.func @transform_7(%arg0: i32) -> (i32, i32) {
    %c0_i32 = arith.constant 0 : i32
    %c0_i32_0 = arith.constant 0 : i32
    %c0_i32_1 = arith.constant 0 : i32
    return %c0_i32, %c0_i32_0 : i32, i32
  }
  func.func @transform_8(%arg0: i32) -> (i32, i32) {
    %c0_i32 = arith.constant 0 : i32
    %c0_i32_0 = arith.constant 0 : i32
    %c0_i32_1 = arith.constant 0 : i32
    return %c0_i32, %c0_i32_0 : i32, i32
  }
  func.func @transform_9(%arg0: i32) -> (i32, i32) {
    %c0_i32 = arith.constant 0 : i32
    %c0_i32_0 = arith.constant 0 : i32
    %c0_i32_1 = arith.constant 0 : i32
    return %c0_i32, %c0_i32_0 : i32, i32
  }
  func.func @transform_10(%arg0: i32) -> (i32, i32) {
    %c0_i32 = arith.constant 0 : i32
    %c0_i32_0 = arith.constant 0 : i32
    %c0_i32_1 = arith.constant 0 : i32
    return %c0_i32, %c0_i32_0 : i32, i32
  }
  func.func @transform_11(%arg0: i32) -> (i32, i32) {
    %c0_i32 = arith.constant 0 : i32
    %c0_i32_0 = arith.constant 0 : i32
    %c0_i32_1 = arith.constant 0 : i32
    return %c0_i32, %c0_i32_0 : i32, i32
  }
  func.func @transform_12(%arg0: i32) -> (i32, i32) {
    %c0_i32 = arith.constant 0 : i32
    %c0_i32_0 = arith.constant 0 : i32
    return %arg0, %c0_i32 : i32, i32
  }
}

</mosaic_0001>

<bundles_post_ra>
// kernel: fraud_detection_forward.1
= control target key start
LH: loop header
LB: loop body
LE: loop exit
PB: predicated region body
PF: predicated region fallthrough
CT: control target
= control target key end

     0   :  { %vm55_vm0 = vcmask 261120   ;;  %vm2911_vm1 = vcmask 130048   ;;  %vm2951_vm2 = vcmask 7168   ;;  %s5800_s1 = inlined_call_operand.vmem [shape: f32[32,128], index: 1, kind: input, shape index: {}]   ;;  %s5801_s0 = inlined_call_operand.vmem [shape: f32[64,32], index: 0, kind: input, shape index: {}]   ;;  %s5802_s4 = inlined_call_operand.vmem [shape: f32[128,128], index: 4, kind: input, shape index: {}]   ;;  %s5803_s2 = inlined_call_operand.vmem [shape: f32[1,128], index: 2, kind: input, shape index: {}]   ;;  %s5804_s3 = inlined_call_operand.vmem [shape: f32[1,128], index: 3, kind: input, shape index: {}]   ;;  %s5805_s7 = inlined_call_operand.vmem [shape: f32[128,16], index: 7, kind: input, shape index: {}]   ;;  %s5806_s5 = inlined_call_operand.vmem [shape: f32[1,128], index: 5, kind: input, shape index: {}]   ;;  %s5807_s6 = inlined_call_operand.vmem [shape: f32[1,128], index: 6, kind: input, shape index: {}]   ;;  %s5808_s11 = inlined_call_operand.<no memory space> [shape: f32[1,1], index: 11, kind: input, shape index: {}]   ;;  %s5809_s8 = inlined_call_operand.vmem [shape: f32[1,16], index: 8, kind: input, shape index: {}]   ;;  %s5810_s9 = inlined_call_operand.vmem [shape: f32[1,16], index: 9, kind: input, shape index: {}]   ;;  %s5811_s10 = inlined_call_operand.vmem [shape: f32[1,16], index: 10, kind: input, shape index: {}]   ;;  %s5812_s12 = inlined_call_operand.vmem [shape: f32[64,1], index: 12, kind: output, shape index: {}]  }
   0x1   :  { %v51_v0 = vld [vmem:[%s5800_s1] sm:$0xff]  ;;  %v52_v1 = vld [vmem:[%s5800_s1 + $0x8] sm:$0xff]  ;;  %v53_v2 = vld [vmem:[%s5800_s1 + $0x10] sm:$0xff] }
   0x2   :  { %v81_v3 = vand.u32 4294901760, %v51_v0  ;;  %v84_v4 = vand.u32 4294901760, %v52_v1  ;;  %v54_v5 = vld [vmem:[%s5800_s1 + $0x18] sm:$0xff]  ;;  %v87_v6 = vand.u32 4294901760, %v53_v2  ;;  %v43_v7 = vld [vmem:[%s5801_s0] sm:$0xff]  ;;  %v44_v16 = vld [vmem:[%s5801_s0 + $0x8] sm:$0xff] }
   0x3   :  { %v90_v8 = vand.u32 4294901760, %v54_v5  ;;  %v57_v9 = vsel %vm55_vm0, %v43_v7, 0  ;;  %v45_v21 = vld [vmem:[%s5801_s0 + $0x10] sm:$0xff]  ;;  %v46_v22 = vld [vmem:[%s5801_s0 + $0x18] sm:$0xff]  ;;  %v60_v27 = vsel %vm55_vm0, %v44_v16, 0  ;;  %v47_v28 = vld [vmem:[%s5801_s0 + $0x20] sm:$0xff] }
   0x4   :  { %v4661_v10 = vpack.c.bf16 %v84_v4, %v81_v3  ;;  %v4663_v11 = vsub.f32 %v51_v0, %v81_v3  ;;  %v4665_v12 = vsub.f32 %v52_v1, %v84_v4  ;;  %v4667_v13 = vsub.f32 %v53_v2, %v87_v6  ;;  %v48_v35 = vld [vmem:[%s5801_s0 + $0x28] sm:$0xff]  ;;  %v49_v39 = vld [vmem:[%s5801_s0 + $0x30] sm:$0xff]  ;;  %v50_v49 = vld [vmem:[%s5801_s0 + $0x38] sm:$0xff] }
   0x5   :  { %v4669_v14 = vsub.f32 %v54_v5, %v90_v8  ;;  %v4671_v15 = vand.u32 4294901760, %v57_v9  ;;  %v4678_v19 = vpack.c.bf16 %v90_v8, %v87_v6  ;;  %v63_v30 = vsel %vm55_vm0, %v45_v21, 0  ;;  %v4776_v3 = vld [vmem:[%s5802_s4] sm:$0xff]  ;;  %v4781_v4 = vld [vmem:[%s5802_s4 + $0x8] sm:$0xff] }
   0x6   :  { %v232_v17 = vand.u32 4294901760, %v4663_v11  ;;  %v239_v18 = vand.u32 4294901760, %v4665_v12  ;;  %v246_v20 = vand.u32 4294901760, %v4667_v13  ;;  %3981 = vmatprep.subr.bf16.mxu1 %v4661_v10  ;;  %v66_v31 = vsel %vm55_vm0, %v46_v22, 0 }
   0x7   :  { %v253_v23 = vand.u32 4294901760, %v4669_v14  ;;  %3360 = vmatprep.mubr.f32.mxu0 %v4671_v15  ;;  %3983 = vmatpush3.bf16.msra.mxu1 %v4661_v10  ;;  %v4713_v37 = vand.u32 4294901760, %v60_v27  ;;  %v69_v38 = vsel %vm55_vm0, %v47_v28, 0  ;;  %v4720_v41 = vand.u32 4294901760, %v63_v30 }
   0x8   :  { %v233_v24 = vsub.f32 %v4663_v11, %v232_v17  ;;  %v240_v25 = vsub.f32 %v4665_v12, %v239_v18  ;;  %v247_v26 = vsub.f32 %v4667_v13, %v246_v20  ;;  %3985 = vmatprep.subr.bf16.mxu1 %v4678_v19  ;;  %v4722_v42 = vand.u32 4294901760, %v66_v31 }
   0x9   :  { %v254_v29 = vsub.f32 %v4669_v14, %v253_v23  ;;  %v4725_v44 = vsub.f32 %v60_v27, %v4713_v37  ;;  %v72_v45 = vsel %vm55_vm0, %v48_v35, 0  ;;  %v4729_v46 = vsub.f32 %v57_v9, %v4671_v15 }
   0xa   :  { %v234_v32 = vand.u32 4294901760, %v233_v24  ;;  %v241_v33 = vand.u32 4294901760, %v240_v25  ;;  %v248_v34 = vand.u32 4294901760, %v247_v26  ;;  %v4731_v47 = vand.u32 4294901760, %v69_v38 }
   0xb   :  { %v255_v36 = vand.u32 4294901760, %v254_v29  ;;  %3987 = vmatpush3.bf16.msra.mxu1 %v4678_v19  ;;  %v75_v48 = vsel %vm55_vm0, %v49_v39, 0  ;;  %v4738_v50 = vsub.f32 %v63_v30, %v4720_v41  ;;  %v4741_v51 = vsub.f32 %v66_v31, %v4722_v42 }
   0xc   :  { %v3988_v40 = vpack.c.bf16 %v241_v33, %v234_v32  ;;  %v3996_v52 = vpack.c.bf16 %v4665_v12, %v4663_v11  ;;  %v151_v53 = vand.u32 4294901760, %v4729_v46  ;;  %v161_v54 = vand.u32 4294901760, %v4725_v44  ;;  %v907_v12 = vld [vmem:[%s5802_s4 + $0x18] sm:$0xff] }
   0xd   :  { %v3992_v43 = vpack.c.bf16 %v255_v36, %v248_v34  ;;  %v4747_v55 = vand.u32 4294901760, %v72_v45  ;;  %v4750_v56 = vsub.f32 %v69_v38, %v4731_v47  ;;  %v171_v57 = vand.u32 4294901760, %v4738_v50 }
   0xe   :  { %3989 = vmatprep.subr.bf16.mxu0 %v3988_v40  ;;  %v181_v58 = vand.u32 4294901760, %v4741_v51  ;;  %v4754_v59 = vand.u32 4294901760, %v75_v48  ;;  %v78_v60 = vsel %vm55_vm0, %v50_v49, 0  ;;  %v152_v61 = vsub.f32 %v4729_v46, %v151_v53  ;;  %v4911_v49 = vld [vmem:[%s5802_s4 + $0x50] sm:$0xff] }
   0xf   :  { %3991 = vmatpush3.bf16.msra.mxu0 %v3988_v40  ;;  %v162_v62 = vsub.f32 %v4725_v44, %v161_v54  ;;  %v4764_v63 = vsub.f32 %v72_v45, %v4747_v55  ;;  %v191_v0 = vand.u32 4294901760, %v4750_v56  ;;  %v172_v1 = vsub.f32 %v4738_v50, %v171_v57  ;;  %v911_v40 = vld [vmem:[%s5802_s4 + $0x38] sm:$0xff]  ;;  %v4900_v45 = vld [vmem:[%s5802_s4 + $0x48] sm:$0xff] }
  0x10   :  { %3993 = vmatprep.subr.bf16.mxu0 %v3992_v43  ;;  %v182_v2 = vsub.f32 %v4741_v51, %v181_v58  ;;  %v4000_v5 = vpack.c.bf16 %v4669_v14, %v4667_v13  ;;  %v4786_v6 = vsub.f32 %v75_v48, %v4754_v59  ;;  %v153_v7 = vand.u32 4294901760, %v152_v61  ;;  %v4957_v61 = vld [vmem:[%s5802_s4 + $0x70] sm:$0xff] }
  0x11   :  { %v163_v8 = vand.u32 4294901760, %v162_v62  ;;  %v4788_v9 = vand.u32 4294901760, %v78_v60  ;;  %v201_v16 = vand.u32 4294901760, %v4764_v63  ;;  %v173_v21 = vand.u32 4294901760, %v172_v1  ;;  %v4962_v62 = vld [vmem:[%s5802_s4 + $0x78] sm:$0xff] }
  0x12   :  { %v192_v22 = vsub.f32 %v4750_v56, %v191_v0  ;;  %v211_v24 = vand.u32 4294901760, %v4786_v6  ;;  %3340 = vmatprep.mubr.f32.mxu1 %v153_v7  ;;  %v921_v25 = vand.u32 4294901760, %v4776_v3  ;;  %v924_v26 = vand.u32 4294901760, %v4781_v4 }
  0x13   :  { %3995 = vmatpush3.bf16.msra.mxu0 %v3992_v43  ;;  %v220_v27 = vsub.f32 %v78_v60, %v4788_v9  ;;  %3341 = vmatmul.mubr.f32.vlgmr.msra.gmra.mrb[0].mxu1 %v163_v8  ;;  %v183_v28 = vand.u32 4294901760, %v182_v2  ;;  %v202_v29 = vsub.f32 %v4764_v63, %v201_v16  ;;  %v4012_v39 = vpack.c.bf16 %v239_v18, %v232_v17  ;;  %v908_v17 = vld [vmem:[%s5802_s4 + $0x20] sm:$0xff]  ;;  %v909_v18 = vld [vmem:[%s5802_s4 + $0x28] sm:$0xff] }
  0x14   :  { %3997 = vmatprep.subr.bf16.mxu0 %v3996_v52  ;;  %v212_v30 = vsub.f32 %v4786_v6, %v211_v24  ;;  %v4806_v31 = vpack.c.bf16 %v924_v26, %v921_v25  ;;  %3343 = vmatprep.mubr.f32.mxu1 %v173_v21  ;;  %v193_v33 = vand.u32 4294901760, %v192_v22  ;;  %v4016_v11 = vpack.c.bf16 %v253_v23, %v246_v20 }
  0x15   :  { %v221_v32 = vand.u32 4294901760, %v220_v27  ;;  %v203_v34 = vand.u32 4294901760, %v202_v29  ;;  %v930_v14 = vand.u32 4294901760, %v907_v12  ;;  %v936_v20 = vand.u32 4294901760, %v909_v18 }
  0x16   :  { %3361 = vmatmul.mubr.f32.vlgmr.msra.gmra.mrb[0].mxu0 %v4713_v37  ;;  %4029 = vmatprep.subr.bf16.mxu1 %v4806_v31  ;;  %v213_v36 = vand.u32 4294901760, %v212_v30  ;;  %v4952_v60 = vsub.f32 %v4781_v4, %v924_v26 }
  0x17   :  { %3999 = vmatpush3.bf16.msra.mxu0 %v3996_v52  ;;  %3363 = vmatprep.mubr.f32.mxu0 %v4720_v41  ;;  %v222_v35 = vsub.f32 %v220_v27, %v221_v32  ;;  %v4984_v7 = vsub.f32 %v907_v12, %v930_v14 }
  0x18   :  { %4001 = vmatprep.subr.bf16.mxu0 %v4000_v5  ;;  %3344 = vmatmul.mubr.f32.gmra.mrb[2].mxu1 %v183_v28  ;;  %v5827_v2 = vand.u32 4294901760, %v4952_v60 }
  0x19   :  { %3346 = vmatprep.mubr.f32.mxu1 %v193_v33  ;;  %4031 = vmatpush3.bf16.msra.mxu1 %v4806_v31  ;;  %v223_v38 = vand.u32 4294901760, %v222_v35  ;;  %v5825_v21 = vand.u32 4294901760, %v4984_v7 }
  0x1a   :  { %3364 = vmatmul.mubr.f32.gmra.mrb[2].mxu0 %v4722_v42 }
  0x1b   :  { %3366 = vmatprep.mubr.f32.mxu0 %v4731_v47  ;;  %4003 = vmatpush3.bf16.msra.mxu0 %v4000_v5  ;;  %v1092_v5 = vsub.f32 %v4952_v60, %v5827_v2 }
  0x1c   :  { %4005 = vmatprep.subr.bf16.mxu0 %v4661_v10  ;;  %3347 = vmatmul.mubr.f32.gmra.mrb[4].mxu1 %v203_v34 }
  0x1d   :  { %3349 = vmatprep.mubr.f32.mxu1 %v213_v36 }
  0x1e   :  { %3367 = vmatmul.mubr.f32.gmra.mrb[4].mxu0 %v4747_v55 }
  0x1f   :  { %3369 = vmatprep.mubr.f32.mxu0 %v4754_v59 }
  0x20   :  { %3350 = vmatmul.mubr.f32.gmra.mrb[6].mxu1 %v223_v38 }
  0x22   :  { %3370 = vmatmul.mubr.f32.gmra.mrb[6].mxu0 %v4788_v9 }
  0x23   :  { %3380 = vmatprep.mubr.f32.mxu0 %v4729_v46 }
  0x26   :  { %3381 = vmatmul.mubr.f32.vlgmr.msra.gmra.mrb[0].mxu0 %v4725_v44  ;;  %v4895_v44 = vld [vmem:[%s5802_s4 + $0x40] sm:$0xff] }
  0x27   :  { %4007 = vmatpush3.bf16.msra.mxu0 %v4661_v10  ;;  %3383 = vmatprep.mubr.f32.mxu0 %v4738_v50  ;;  %v945_v46 = vand.u32 4294901760, %v4895_v44  ;;  %v4916_v50 = vld [vmem:[%s5802_s4 + $0x58] sm:$0xff] }
  0x28   :  { %4009 = vmatprep.subr.bf16.mxu0 %v4678_v19  ;;  %v954_v52 = vand.u32 4294901760, %v4916_v50 }
  0x2a   :  { %3384 = vmatmul.mubr.f32.gmra.mrb[2].mxu0 %v4741_v51  ;;  %v951_v51 = vand.u32 4294901760, %v4911_v49 }
  0x2b   :  { %3386 = vmatprep.mubr.f32.mxu0 %v4750_v56  ;;  %4011 = vmatpush3.bf16.msra.mxu0 %v4678_v19 }
  0x2c   :  { %4013 = vmatprep.subr.bf16.mxu0 %v4012_v39 }
  0x2e   :  { %3387 = vmatmul.mubr.f32.gmra.mrb[4].mxu0 %v4764_v63  ;;  %v963_v63 = vand.u32 4294901760, %v4957_v61 }
  0x2f   :  { %3389 = vmatprep.mubr.f32.mxu0 %v4786_v6 }
  0x32   :  { %3390 = vmatmul.mubr.f32.gmra.mrb[6].mxu0 %v220_v27  ;;  %v5000_v27 = vsub.f32 %v909_v18, %v936_v20 }
  0x33   :  { %3400 = vmatprep.mubr.f32.mxu0 %v151_v53  ;;  %v4922_v53 = vpack.c.bf16 %v954_v52, %v951_v51 }
  0x36   :  { %3401 = vmatmul.mubr.f32.vlgmr.msra.gmra.mrb[0].mxu0 %v161_v54  ;;  %v4927_v54 = vld [vmem:[%s5802_s4 + $0x60] sm:$0xff] }
  0x37   :  { %4015 = vmatpush3.bf16.msra.mxu0 %v4012_v39  ;;  %3403 = vmatprep.mubr.f32.mxu0 %v171_v57  ;;  %v957_v56 = vand.u32 4294901760, %v4927_v54 }
  0x38   :  { %4017 = vmatprep.subr.bf16.mxu0 %v4016_v11 }
  0x3a   :  { %3404 = vmatmul.mubr.f32.gmra.mrb[2].mxu0 %v181_v58 }
  0x3b   :  { %3406 = vmatprep.mubr.f32.mxu0 %v191_v0  ;;  %4019 = vmatpush3.bf16.msra.mxu0 %v4016_v11  ;;  %v966_v0 = vand.u32 4294901760, %v4962_v62 }
  0x3c   :  { %4021 = vmatprep.subr.bf16.mxu0 %v4661_v10 }
  0x3e   :  { %3407 = vmatmul.mubr.f32.gmra.mrb[4].mxu0 %v201_v16 }
  0x3f   :  { %3409 = vmatprep.mubr.f32.mxu0 %v211_v24 }
  0x42   :  { %3410 = vmatmul.mubr.f32.gmra.mrb[6].mxu0 %v221_v32  ;;  %v5823_v32 = vand.u32 4294901760, %v5000_v27 }
  0x43   :  { %3420 = vmatprep.mubr.f32.mxu0 %v4671_v15 }
  0x44   :  { %v1120_v35 = vsub.f32 %v5000_v27, %v5823_v32 }
  0x46   :  { %3421 = vmatmul.mubr.f32.vlgmr.msra.gmra.mrb[0].mxu0 %v4713_v37  ;;  %v1121_v11 = vand.u32 4294901760, %v1120_v35 }
  0x47   :  { %4023 = vmatpush3.bf16.msra.mxu0 %v4661_v10  ;;  %3423 = vmatprep.mubr.f32.mxu0 %v4720_v41  ;;  %v906_v10 = vld [vmem:[%s5802_s4 + $0x10] sm:$0xff] }
  0x48   :  { %4025 = vmatprep.subr.bf16.mxu0 %v4678_v19  ;;  %v927_v13 = vand.u32 4294901760, %v906_v10 }
  0x4a   :  { %3424 = vmatmul.mubr.f32.gmra.mrb[2].mxu0 %v4722_v42  ;;  %v4982_v6 = vsub.f32 %v906_v10, %v927_v13 }
  0x4b   :  { %3426 = vmatprep.mubr.f32.mxu0 %v4731_v47  ;;  %4027 = vmatpush3.bf16.msra.mxu0 %v4678_v19  ;;  %v933_v19 = vand.u32 4294901760, %v908_v17 }
  0x4c   :  { %v5826_v16 = vand.u32 4294901760, %v4982_v6 }
  0x4d   :  { %v4880_v23 = vpack.c.bf16 %v936_v20, %v933_v19  ;;  %v4998_v26 = vsub.f32 %v908_v17, %v933_v19  ;;  %v5025_v17 = vsub.f32 %v4895_v44, %v945_v46 }
  0x4e   :  { %3427 = vmatmul.mubr.f32.gmra.mrb[4].mxu0 %v4747_v55  ;;  %v1099_v24 = vsub.f32 %v4982_v6, %v5826_v16 }
  0x4f   :  { %3429 = vmatprep.mubr.f32.mxu0 %v4754_v59  ;;  %v5824_v30 = vand.u32 4294901760, %v4998_v26 }
  0x50   :  { %v1100_v28 = vand.u32 4294901760, %v1099_v24 }
  0x51   :  { %v1113_v34 = vsub.f32 %v4998_v26, %v5824_v30 }
  0x52   :  { %3430 = vmatmul.mubr.f32.gmra.mrb[6].mxu0 %v4788_v9 }
  0x53   :  { %3440 = vmatprep.mubr.f32.mxu0 %v4671_v15  ;;  %v4870_v15 = vpack.c.bf16 %v930_v14, %v927_v13  ;;  %v1114_v39 = vand.u32 4294901760, %v1113_v34 }
  0x55   :  { %4033 = vmatprep.subr.bf16.mxu1 %v4870_v15  ;;  %v5019_v13 = vpack.c.bf16 %v1121_v11, %v1114_v39 }
  0x56   :  { %3441 = vmatmul.mubr.f32.vlgmr.msra.gmra.mrb[0].mxu0 %v4713_v37  ;;  %4035 = vmatpush3.bf16.msra.mxu1 %v4870_v15  ;;  %v910_v37 = vld [vmem:[%s5802_s4 + $0x30] sm:$0xff] }
  0x57   :  { %3443 = vmatprep.mubr.f32.mxu0 %v4720_v41  ;;  %4037 = vmatprep.subr.bf16.mxu1 %v4880_v23  ;;  %v939_v41 = vand.u32 4294901760, %v910_v37 }
  0x59   :  { %v5013_v36 = vsub.f32 %v910_v37, %v939_v41  ;;  %v5820_v37 = vand.u32 4294901760, %v5025_v17 }
  0x5a   :  { %3444 = vmatmul.mubr.f32.gmra.mrb[2].mxu0 %v4722_v42  ;;  %v942_v42 = vand.u32 4294901760, %v911_v40  ;;  %4039 = vmatpush3.bf16.msra.mxu1 %v4880_v23 }
  0x5b   :  { %3446 = vmatprep.mubr.f32.mxu0 %v4731_v47  ;;  %v948_v47 = vand.u32 4294901760, %v4900_v45  ;;  %v5822_v10 = vand.u32 4294901760, %v5013_v36 }
  0x5c   :  { %v4890_v43 = vpack.c.bf16 %v942_v42, %v939_v41  ;;  %v5015_v38 = vsub.f32 %v911_v40, %v942_v42  ;;  %v1141_v42 = vsub.f32 %v5025_v17, %v5820_v37 }
  0x5d   :  { %v4906_v48 = vpack.c.bf16 %v948_v47, %v945_v46  ;;  %v1127_v14 = vsub.f32 %v5013_v36, %v5822_v10  ;;  %v5028_v18 = vsub.f32 %v4900_v45, %v948_v47  ;;  %v5042_v45 = vsub.f32 %v4911_v49, %v951_v51 }
  0x5e   :  { %3447 = vmatmul.mubr.f32.gmra.mrb[4].mxu0 %v4747_v55  ;;  %4041 = vmatprep.subr.bf16.mxu1 %v4890_v43  ;;  %v4932_v55 = vld [vmem:[%s5802_s4 + $0x68] sm:$0xff]  ;;  %v5821_v12 = vand.u32 4294901760, %v5015_v38  ;;  %v5045_v46 = vsub.f32 %v4916_v50, %v954_v52  ;;  %v5062_v50 = vsub.f32 %v4927_v54, %v957_v56  ;;  %v5079_v54 = vsub.f32 %v4957_v61, %v963_v63 }
  0x5f   :  { %3449 = vmatprep.mubr.f32.mxu0 %v4754_v59  ;;  %4043 = vmatpush3.bf16.msra.mxu1 %v4890_v43  ;;  %v960_v57 = vand.u32 4294901760, %v4932_v55  ;;  %v4947_v59 = vsub.f32 %v4776_v3, %v921_v25  ;;  %v4974_v3 = vpack.c.bf16 %v966_v0, %v963_v63  ;;  %v1106_v25 = vsub.f32 %v4984_v7, %v5825_v21 }
  0x60   :  { %4045 = vmatprep.subr.bf16.mxu1 %v4906_v48  ;;  %v1134_v19 = vsub.f32 %v5015_v38, %v5821_v12  ;;  %v1128_v20 = vand.u32 4294901760, %v1127_v14  ;;  %v5819_v40 = vand.u32 4294901760, %v5028_v18  ;;  %5863 = vst [vmem:[#allocation3_spill] sm:$0xff] %v5062_v50  ;;  %5865 = vst [vmem:[#allocation5_spill] sm:$0xff] %v5079_v54  ;;  %v5814_v11 = vand.u32 4294901760, %v5079_v54 }
  0x61   :  { %v4942_v58 = vpack.c.bf16 %v960_v57, %v957_v56  ;;  %v5828_v1 = vand.u32 4294901760, %v4947_v59  ;;  %v1107_v29 = vand.u32 4294901760, %v1106_v25  ;;  %v5067_v51 = vsub.f32 %v4932_v55, %v960_v57 }
  0x62   :  { %3450 = vmatmul.mubr.f32.gmra.mrb[6].mxu0 %v4788_v9  ;;  %v1093_v9 = vand.u32 4294901760, %v1092_v5  ;;  %v1135_v41 = vand.u32 4294901760, %v1134_v19  ;;  %v1148_v44 = vsub.f32 %v5028_v18, %v5819_v40  ;;  %v5084_v55 = vsub.f32 %v4962_v62, %v966_v0 }
  0x63   :  { %4047 = vmatpush3.bf16.msra.mxu1 %v4906_v48  ;;  %v1085_v4 = vsub.f32 %v4947_v59, %v5828_v1  ;;  %v5005_v33 = vpack.c.bf16 %v1107_v29, %v1100_v28  ;;  %5864 = vst [vmem:[#allocation4_spill] sm:$0xff] %v5067_v51  ;;  %v5816_v29 = vand.u32 4294901760, %v5062_v50  ;;  %v5815_v34 = vand.u32 4294901760, %v5067_v51 }
  0x64   :  { %4049 = vmatprep.subr.bf16.mxu1 %v4922_v53  ;;  %v5047_v47 = vpack.c.bf16 %v1135_v41, %v1128_v20  ;;  %v1149_v5 = vand.u32 4294901760, %v1148_v44  ;;  %5866 = vst [vmem:[#allocation6_spill] sm:$0xff] %v5084_v55  ;;  %v5813_v14 = vand.u32 4294901760, %v5084_v55  ;;  %v1183_v61 = vsub.f32 %v5079_v54, %v5814_v11  ;;  %v2964_v11 = vld [vmem:[%s5803_s2] ss:$0 sm:$0xff] }
  0x65   :  { %v1086_v8 = vand.u32 4294901760, %v1085_v4  ;;  %v1142_v4 = vand.u32 4294901760, %v1141_v42  ;;  %v1169_v39 = vsub.f32 %v5062_v50, %v5816_v29  ;;  %v1176_v56 = vsub.f32 %v5067_v51, %v5815_v34 }
  0x66   :  { %v1190_v63 = vsub.f32 %v5084_v55, %v5813_v14  ;;  %v1184_v0 = vand.u32 4294901760, %v1183_v61  ;;  %v5103_v42 = vpack.c.bf16 %v4952_v60, %v4947_v59 }
  0x67   :  { %4051 = vmatpush3.bf16.msra.mxu1 %v4922_v53  ;;  %v4990_v22 = vpack.c.bf16 %v1093_v9, %v1086_v8  ;;  %v5818_v8 = vand.u32 4294901760, %v5042_v45  ;;  %v5817_v9 = vand.u32 4294901760, %v5045_v46  ;;  %v5051_v24 = vpack.c.bf16 %v1149_v5, %v1142_v4 }
  0x68   :  { %4053 = vmatprep.subr.bf16.mxu1 %v4942_v58  ;;  %v1170_v57 = vand.u32 4294901760, %v1169_v39  ;;  %v1177_v19 = vand.u32 4294901760, %v1176_v56  ;;  %v1191_v20 = vand.u32 4294901760, %v1190_v63  ;;  %v5107_v4 = vpack.c.bf16 %v4984_v7, %v4982_v6 }
  0x69   :  { %v1155_v25 = vsub.f32 %v5042_v45, %v5818_v8  ;;  %v1162_v49 = vsub.f32 %v5045_v46, %v5817_v9  ;;  %v5115_v39 = vpack.c.bf16 %v5015_v38, %v5013_v36  ;;  %v5123_v63 = vpack.c.bf16 %v5045_v46, %v5042_v45  ;;  %v2965_v9 = vld [vmem:[%s5804_s3] ss:$0 sm:$0xff] }
  0x6a   :  { %v5097_v62 = vpack.c.bf16 %v1177_v19, %v1170_v57  ;;  %v5099_v41 = vpack.c.bf16 %v1191_v20, %v1184_v0  ;;  %v5119_v57 = vpack.c.bf16 %v5028_v18, %v5025_v17  ;;  %v5127_v0 = vpack.c.bf16 %v5067_v51, %v5062_v50 }
  0x6b   :  { %4055 = vmatpush3.bf16.msra.mxu1 %v4942_v58  ;;  %v1156_v52 = vand.u32 4294901760, %v1155_v25  ;;  %v1163_v28 = vand.u32 4294901760, %v1162_v49  ;;  %v5111_v49 = vpack.c.bf16 %v5000_v27, %v4998_v26  ;;  %v5131_v20 = vpack.c.bf16 %v5084_v55, %v5079_v54 }
  0x6c   :  { %4057 = vmatprep.subr.bf16.mxu1 %v4974_v3 }
  0x6d   :  { %v5071_v35 = vpack.c.bf16 %v1163_v28, %v1156_v52 }
  0x6f   :  { %4059 = vmatpush3.bf16.msra.mxu1 %v4974_v3 }
  0x70   :  { %4061 = vmatprep.subr.bf16.mxu1 %v4990_v22 }
  0xe6   :  { %v3342_v44 = vpop.f32.mrb[0].mxu1 }
  0xe7   :  { %v155_v5 = vpop.f32.mrb[1].mxu1 }
  0xeb   :  { %v3345_v25 = vpop.f32.mrb[2].mxu1 }
  0xec   :  { %v175_v52 = vpop.f32.mrb[3].mxu1 }
  0xef   :  { %v3348_v28 = vpop.f32.mrb[4].mxu1 }
  0xf0   :  { %v195_v56 = vpop.f32.mrb[5].mxu1 }
  0xf3   :  { %v3351_v19 = vpop.f32.mrb[6].mxu1 }
  0xf4   :  { %v215_v61 = vpop.f32.mrb[7].mxu1 }
 0x129   :  { %v3442_v14 = vpop.f32.mrb[0].mxu0 }
 0x12a   :  { %v4412_v34 = vadd.f32 %v3442_v14, %v3342_v44  ;;  %v820_v29 = vpop.f32.mrb[1].mxu0 }
 0x12b   :  { %v4413_v8 = vadd.f32 %v820_v29, %v155_v5 }
 0x12c   :  { %v874_v40 = vmul.f32 %v4412_v34, %v2964_v11 }
 0x12d   :  { %v873_v37 = vmul.f32 %v4413_v8, %v2964_v11  ;;  %v3445_v12 = vpop.f32.mrb[2].mxu0 }
 0x12e   :  { %v889_v10 = vadd.f32 %v2965_v9, %v874_v40  ;;  %v4414_v32 = vadd.f32 %v3445_v12, %v3345_v25  ;;  %v832_v30 = vpop.f32.mrb[3].mxu0 }
 0x12f   :  { %v888_v21 = vadd.f32 %v2965_v9, %v873_v37  ;;  %v4415_v16 = vadd.f32 %v832_v30, %v175_v52 }
 0x130   :  { %4532 = vtanh.f32 %v889_v10  ;;  %v876_v2 = vmul.f32 %v4414_v32, %v2964_v11 }
 0x131   :  { %4534 = vtanh.f32 %v888_v21  ;;  %v875_v1 = vmul.f32 %v4415_v16, %v2964_v11  ;;  %v3448_v55 = vpop.f32.mrb[4].mxu0 }
 0x132   :  { %v891_v14 = vadd.f32 %v2965_v9, %v876_v2  ;;  %v4416_v44 = vadd.f32 %v3448_v55, %v3348_v28  ;;  %v844_v54 = vpop.f32.mrb[5].mxu0 }
 0x133   :  { %v890_v51 = vadd.f32 %v2965_v9, %v875_v1  ;;  %v4417_v50 = vadd.f32 %v844_v54, %v195_v56 }
 0x134   :  { %4536 = vtanh.f32 %v891_v14  ;;  %v878_v29 = vmul.f32 %v4416_v44, %v2964_v11 }
 0x135   :  { %4538 = vtanh.f32 %v890_v51  ;;  %v877_v8 = vmul.f32 %v4417_v50, %v2964_v11  ;;  %v3451_v34 = vpop.f32.mrb[6].mxu0 }
 0x136   :  { %v893_v40 = vadd.f32 %v2965_v9, %v878_v29  ;;  %v4418_v12 = vadd.f32 %v3451_v34, %v3351_v19  ;;  %v856_v5 = vpop.f32.mrb[7].mxu0 }
 0x137   :  { %v892_v37 = vadd.f32 %v2965_v9, %v877_v8  ;;  %v4419_v30 = vadd.f32 %v856_v5, %v215_v61 }
 0x138   :  { %4540 = vtanh.f32 %v893_v40  ;;  %v880_v32 = vmul.f32 %v4418_v12, %v2964_v11 }
 0x139   :  { %4542 = vtanh.f32 %v892_v37  ;;  %v879_v16 = vmul.f32 %v4419_v30, %v2964_v11 }
 0x13a   :  { %v4533_v21 = vpop.eup %4532  ;;  %v895_v2 = vadd.f32 %v2965_v9, %v880_v32 }
 0x13b   :  { %v4535_v10 = vpop.eup %4534  ;;  %v5139_v55 = vand.u32 4294901760, %v4533_v21  ;;  %v894_v1 = vadd.f32 %v2965_v9, %v879_v16 }
 0x13c   :  { %v5141_v54 = vand.u32 4294901760, %v4535_v10  ;;  %4544 = vtanh.f32 %v895_v2 }
 0x13d   :  { %v5144_v50 = vsub.f32 %v4533_v21, %v5139_v55  ;;  %4546 = vtanh.f32 %v894_v1 }
 0x13e   :  { %v4537_v51 = vpop.eup %4536  ;;  %v5147_v25 = vsub.f32 %v4535_v10, %v5141_v54 }
 0x13f   :  { %v4539_v52 = vpop.eup %4538  ;;  %v5149_v28 = vand.u32 4294901760, %v4537_v51  ;;  %v5840_v11 = vand.u32 4294901760, %v5144_v50 }
 0x140   :  { %v5152_v56 = vand.u32 4294901760, %v4539_v52  ;;  %v5841_v9 = vand.u32 4294901760, %v5147_v25 }
 0x141   :  { %v1014_v19 = vsub.f32 %v5144_v50, %v5840_v11  ;;  %v5159_v61 = vsub.f32 %v4537_v51, %v5149_v28 }
 0x142   :  { %v4541_v14 = vpop.eup %4540  ;;  %v1004_v44 = vsub.f32 %v5147_v25, %v5841_v9  ;;  %v5165_v29 = vsub.f32 %v4539_v52, %v5152_v56 }
 0x143   :  { %v4543_v8 = vpop.eup %4542  ;;  %v5167_v34 = vand.u32 4294901760, %v4541_v14  ;;  %v5833_v40 = vand.u32 4294901760, %v5159_v61  ;;  %v1015_v30 = vand.u32 4294901760, %v1014_v19 }
 0x144   :  { %v5170_v12 = vand.u32 4294901760, %v4543_v8  ;;  %v1005_v5 = vand.u32 4294901760, %v1004_v44  ;;  %v5834_v37 = vand.u32 4294901760, %v5165_v29 }
 0x145   :  { %v1034_v32 = vsub.f32 %v5159_v61, %v5833_v40  ;;  %v5177_v16 = vsub.f32 %v4541_v14, %v5167_v34 }
 0x146   :  { %v4545_v21 = vpop.eup %4544  ;;  %3484 = vmatprep.mubr.f32.mxu1 %v1005_v5  ;;  %v1024_v2 = vsub.f32 %v5165_v29, %v5834_v37  ;;  %v5183_v10 = vsub.f32 %v4543_v8, %v5170_v12 }
 0x147   :  { %v4547_v1 = vpop.eup %4546  ;;  %v5185_v51 = vand.u32 4294901760, %v4545_v21  ;;  %3485 = vmatmul.mubr.f32.vlgmr.msra.gmra.mrb[8].mxu1 %v1015_v30  ;;  %v5837_v52 = vand.u32 4294901760, %v5177_v16  ;;  %v1035_v5 = vand.u32 4294901760, %v1034_v32 }
 0x148   :  { %v5188_v19 = vand.u32 4294901760, %v4547_v1  ;;  %4063 = vmatpush3.bf16.msra.mxu1 %v4990_v22  ;;  %v1025_v14 = vand.u32 4294901760, %v1024_v2  ;;  %v5838_v44 = vand.u32 4294901760, %v5183_v10 }
 0x149   :  { %4065 = vmatprep.subr.bf16.mxu1 %v5005_v33  ;;  %v1054_v8 = vsub.f32 %v5177_v16, %v5837_v52  ;;  %v5197_v40 = vsub.f32 %v4545_v21, %v5185_v51 }
 0x14a   :  { %3487 = vmatprep.mubr.f32.mxu1 %v1025_v14  ;;  %v1044_v30 = vsub.f32 %v5183_v10, %v5838_v44  ;;  %v5203_v22 = vsub.f32 %v4547_v1, %v5188_v19 }
 0x14b   :  { %3488 = vmatmul.mubr.f32.gmra.mrb[10].mxu1 %v1035_v5  ;;  %v5835_v2 = vand.u32 4294901760, %v5197_v40  ;;  %v1055_v21 = vand.u32 4294901760, %v1054_v8 }
 0x14c   :  { %4067 = vmatpush3.bf16.msra.mxu1 %v5005_v33  ;;  %v1045_v32 = vand.u32 4294901760, %v1044_v30  ;;  %v5836_v37 = vand.u32 4294901760, %v5203_v22 }
 0x14d   :  { %4069 = vmatprep.subr.bf16.mxu1 %v5019_v13  ;;  %v1074_v14 = vsub.f32 %v5197_v40, %v5835_v2 }
 0x14e   :  { %3490 = vmatprep.mubr.f32.mxu1 %v1045_v32  ;;  %v1064_v1 = vsub.f32 %v5203_v22, %v5836_v37 }
 0x14f   :  { %3491 = vmatmul.mubr.f32.gmra.mrb[12].mxu1 %v1055_v21  ;;  %v1075_v33 = vand.u32 4294901760, %v1074_v14 }
 0x150   :  { %4071 = vmatpush3.bf16.msra.mxu1 %v5019_v13  ;;  %v1065_v5 = vand.u32 4294901760, %v1064_v1  ;;  %v1900_v13 = vld [vmem:[%s5805_s7] sm:$0xff] }
 0x151   :  { %4073 = vmatprep.subr.bf16.mxu1 %v5047_v47 }
 0x152   :  { %3493 = vmatprep.mubr.f32.mxu1 %v1065_v5  ;;  %v1906_v5 = vld [vmem:[%s5805_s7 + $0x30] sm:$0xff] }
 0x153   :  { %3494 = vmatmul.mubr.f32.gmra.mrb[14].mxu1 %v1075_v33  ;;  %v1907_v33 = vld [vmem:[%s5805_s7 + $0x38] sm:$0xff] }
 0x154   :  { %4075 = vmatpush3.bf16.msra.mxu1 %v5047_v47  ;;  %3528 = vmatprep.mubr.f32.mxu1 %v5141_v54  ;;  %v1901_v47 = vld [vmem:[%s5805_s7 + $0x8] sm:$0xff] }
 0x155   :  { %4077 = vmatprep.subr.bf16.mxu1 %v5051_v24 }
 0x158   :  { %4079 = vmatpush3.bf16.msra.mxu1 %v5051_v24  ;;  %v1902_v24 = vld [vmem:[%s5805_s7 + $0x10] sm:$0xff] }
 0x159   :  { %4081 = vmatprep.subr.bf16.mxu1 %v5071_v35 }
 0x15c   :  { %4083 = vmatpush3.bf16.msra.mxu1 %v5071_v35  ;;  %v1917_v35 = vand.u32 4294901760, %v1900_v13 }
 0x15d   :  { %4085 = vmatprep.subr.bf16.mxu1 %v5097_v62 }
 0x15e   :  { %v5264_v21 = vsub.f32 %v1900_v13, %v1917_v35 }
 0x160   :  { %4087 = vmatpush3.bf16.msra.mxu1 %v5097_v62  ;;  %v1920_v62 = vand.u32 4294901760, %v1901_v47  ;;  %5867 = vst [vmem:[#allocation7_spill] sm:$0xff] %v5264_v21 }
 0x161   :  { %4089 = vmatprep.subr.bf16.mxu1 %v5099_v41 }
 0x162   :  { %v5262_v32 = vpack.c.bf16 %v1920_v62, %v1917_v35  ;;  %v5266_v14 = vsub.f32 %v1901_v47, %v1920_v62 }
 0x164   :  { %4091 = vmatpush3.bf16.msra.mxu1 %v5099_v41  ;;  %v1903_v41 = vld [vmem:[%s5805_s7 + $0x18] sm:$0xff]  ;;  %5868 = vst [vmem:[#allocation8_spill] sm:$0xff] %v5266_v14  ;;  %v5842_v35 = vand.u32 4294901760, %v5266_v14 }
 0x165   :  { %4093 = vmatprep.subr.bf16.mxu1 %v5103_v42 }
 0x167   :  { %3529 = vmatmul.mubr.f32.vlgmr.msra.gmra.mrb[8].mxu1 %v5139_v55 }
 0x168   :  { %3531 = vmatprep.mubr.f32.mxu1 %v5152_v56  ;;  %4095 = vmatpush3.bf16.msra.mxu1 %v5103_v42  ;;  %v1923_v42 = vand.u32 4294901760, %v1902_v24 }
 0x169   :  { %4097 = vmatprep.subr.bf16.mxu1 %v5107_v4 }
 0x16a   :  { %v5268_v1 = vsub.f32 %v1902_v24, %v1923_v42  ;;  %v5839_v24 = vand.u32 4294901760, %v5264_v21 }
 0x16b   :  { %3532 = vmatmul.mubr.f32.gmra.mrb[10].mxu1 %v5149_v28 }
 0x16c   :  { %3534 = vmatprep.mubr.f32.mxu1 %v5170_v12  ;;  %4099 = vmatpush3.bf16.msra.mxu1 %v5107_v4  ;;  %v1904_v4 = vld [vmem:[%s5805_s7 + $0x20] sm:$0xff]  ;;  %5869 = vst [vmem:[#allocation9_spill] sm:$0xff] %v5268_v1  ;;  %v5843_v62 = vand.u32 4294901760, %v5268_v1 }
 0x16d   :  { %4101 = vmatprep.subr.bf16.mxu1 %v5111_v49  ;;  %v1929_v8 = vand.u32 4294901760, %v1904_v4 }
 0x16e   :  { %v2095_v44 = vsub.f32 %v5268_v1, %v5843_v62 }
 0x16f   :  { %3535 = vmatmul.mubr.f32.gmra.mrb[12].mxu1 %v5167_v34  ;;  %v5283_v47 = vsub.f32 %v1904_v4, %v1929_v8  ;;  %v2081_v4 = vsub.f32 %v5264_v21, %v5839_v24 }
 0x170   :  { %3537 = vmatprep.mubr.f32.mxu1 %v5188_v19  ;;  %4103 = vmatpush3.bf16.msra.mxu1 %v5111_v49  ;;  %v1905_v49 = vld [vmem:[%s5805_s7 + $0x28] sm:$0xff]  ;;  %v2096_v1 = vand.u32 4294901760, %v2095_v44 }
 0x171   :  { %4105 = vmatprep.subr.bf16.mxu1 %v5115_v39  ;;  %v1932_v30 = vand.u32 4294901760, %v1905_v49  ;;  %5871 = vst [vmem:[#allocation11_spill] sm:$0xff] %v5283_v47 }
 0x173   :  { %3538 = vmatmul.mubr.f32.gmra.mrb[14].mxu1 %v5185_v51  ;;  %v5281_v13 = vpack.c.bf16 %v1932_v30, %v1929_v8  ;;  %v5289_v52 = vsub.f32 %v1905_v49, %v1932_v30  ;;  %v2088_v8 = vsub.f32 %v5266_v14, %v5842_v35  ;;  %v2082_v35 = vand.u32 4294901760, %v2081_v4 }
 0x174   :  { %4107 = vmatpush3.bf16.msra.mxu1 %v5115_v39  ;;  %3572 = vmatprep.mubr.f32.mxu1 %v5147_v25  ;;  %v1926_v39 = vand.u32 4294901760, %v1903_v41  ;;  %v5878_v4 = vand.u32 4294901760, %v5165_v29 }
 0x175   :  { %4109 = vmatprep.subr.bf16.mxu1 %v5119_v57  ;;  %v2115_v49 = vand.u32 4294901760, %v5289_v52  ;;  %v2089_v62 = vand.u32 4294901760, %v2088_v8 }
 0x176   :  { %v5277_v2 = vpack.c.bf16 %v1926_v39, %v1923_v42  ;;  %v5279_v37 = vsub.f32 %v1903_v41, %v1926_v39  ;;  %v5853_v42 = vand.u32 4294901760, %v5283_v47  ;;  %v1935_v41 = vand.u32 4294901760, %v1906_v5 }
 0x177   :  { %v1938_v39 = vand.u32 4294901760, %v1907_v33  ;;  %v4252_v21 = vpack.c.bf16 %v2089_v62, %v2082_v35  ;;  %v5876_v62 = vand.u32 4294901760, %v4984_v7  ;;  %v5883_v7 = vand.u32 4294901760, %v5013_v36 }
 0x178   :  { %4111 = vmatpush3.bf16.msra.mxu1 %v5119_v57  ;;  %5870 = vst [vmem:[#allocation10_spill] sm:$0xff] %v5279_v37  ;;  %v5848_v57 = vand.u32 4294901760, %v5279_v37  ;;  %v2109_v24 = vsub.f32 %v5283_v47, %v5853_v42  ;;  %v5312_v9 = vsub.f32 %v1906_v5, %v1935_v41  ;;  %v5890_v36 = vand.u32 4294901760, %v5042_v45 }
 0x179   :  { %4113 = vmatprep.subr.bf16.mxu1 %v5123_v63  ;;  %v5310_v11 = vpack.c.bf16 %v1938_v39, %v1935_v41  ;;  %4253 = vmatprep.subr.bf16.mxu0 %v4252_v21 }
 0x17a   :  { %v2102_v30 = vsub.f32 %v5279_v37, %v5848_v57  ;;  %v2122_v57 = vand.u32 4294901760, %v5312_v9  ;;  %v5319_v37 = vsub.f32 %v1907_v33, %v1938_v39  ;;  %v2110_v42 = vand.u32 4294901760, %v2109_v24  ;;  %4255 = vmatpush3.bf16.msra.mxu0 %v4252_v21 }
 0x17b   :  { %v5873_v21 = vand.u32 4294901760, %v4947_v59  ;;  %v5877_v39 = vand.u32 4294901760, %v5144_v50  ;;  %v5879_v59 = vand.u32 4294901760, %v4998_v26  ;;  %v5886_v26 = vand.u32 4294901760, %v5203_v22 }
 0x17c   :  { %4115 = vmatpush3.bf16.msra.mxu1 %v5123_v63  ;;  %v2116_v63 = vsub.f32 %v5289_v52, %v2115_v49  ;;  %v2103_v14 = vand.u32 4294901760, %v2102_v30  ;;  %v2123_v41 = vsub.f32 %v5312_v9, %v2122_v57  ;;  %v2129_v44 = vand.u32 4294901760, %v5319_v37 }
 0x17d   :  { %4117 = vmatprep.subr.bf16.mxu1 %v5127_v0  ;;  %v5881_v30 = vand.u32 4294901760, %v5159_v61 }
 0x17e   :  { %v2117_v47 = vand.u32 4294901760, %v2116_v63  ;;  %v4256_v5 = vpack.c.bf16 %v2103_v14, %v2096_v1  ;;  %v2130_v33 = vsub.f32 %v5319_v37, %v2129_v44  ;;  %v2124_v35 = vand.u32 4294901760, %v2123_v41 }
 0x17f   :  { %v5874_v1 = vand.u32 4294901760, %v4952_v60  ;;  %v5880_v60 = vand.u32 4294901760, %v5000_v27  ;;  %v5885_v63 = vand.u32 4294901760, %v5177_v16  ;;  %v5887_v27 = vand.u32 4294901760, %v5025_v17  ;;  %v5894_v17 = vld [vmem:[#allocation4_spill] sm:$0xff] }
 0x180   :  { %4119 = vmatpush3.bf16.msra.mxu1 %v5127_v0  ;;  %4257 = vmatprep.subr.bf16.mxu0 %v4256_v5  ;;  %v4260_v24 = vpack.c.bf16 %v2117_v47, %v2110_v42  ;;  %v2131_v0 = vand.u32 4294901760, %v2130_v33  ;;  %v5875_v47 = vand.u32 4294901760, %v4982_v6  ;;  %v5882_v6 = vand.u32 4294901760, %v5183_v10 }
 0x181   :  { %4121 = vmatprep.subr.bf16.mxu1 %v5131_v20  ;;  %4259 = vmatpush3.bf16.msra.mxu0 %v4256_v5  ;;  %v4164_v8 = vpack.c.bf16 %v5880_v60, %v5879_v59  ;;  %v5889_v5 = vand.u32 4294901760, %v5197_v40  ;;  %v5895_v33 = vand.u32 4294901760, %v5894_v17 }
 0x182   :  { %4261 = vmatprep.subr.bf16.mxu0 %v4260_v24  ;;  %v4264_v14 = vpack.c.bf16 %v2131_v0, %v2124_v35  ;;  %v4160_v42 = vpack.c.bf16 %v5876_v62, %v5875_v47  ;;  %v5898_v35 = vld [vmem:[#allocation6_spill] sm:$0xff] }
 0x183   :  { %v5899_v0 = vand.u32 4294901760, %v5898_v35 }
 0x184   :  { %4123 = vmatpush3.bf16.msra.mxu1 %v5131_v20  ;;  %v5872_v20 = vand.u32 4294901760, %v5147_v25  ;;  %v4156_v25 = vpack.c.bf16 %v5874_v1, %v5873_v21 }
 0x185   :  { %4125 = vmatprep.subr.bf16.mxu1 %v4806_v31  ;;  %4263 = vmatpush3.bf16.msra.mxu0 %v4260_v24 }
 0x186   :  { %4265 = vmatprep.subr.bf16.mxu0 %v4264_v14 }
 0x187   :  { %3573 = vmatmul.mubr.f32.vlgmr.msra.gmra.mrb[8].mxu1 %v5144_v50  ;;  %v5884_v50 = vand.u32 4294901760, %v5015_v38  ;;  %v5891_v38 = vand.u32 4294901760, %v5045_v46 }
 0x188   :  { %3575 = vmatprep.mubr.f32.mxu1 %v5165_v29  ;;  %4127 = vmatpush3.bf16.msra.mxu1 %v4806_v31 }
 0x189   :  { %4129 = vmatprep.subr.bf16.mxu1 %v4870_v15  ;;  %4267 = vmatpush3.bf16.msra.mxu0 %v4264_v14  ;;  %v4168_v29 = vpack.c.bf16 %v5884_v50, %v5883_v7 }
 0x18b   :  { %3576 = vmatmul.mubr.f32.gmra.mrb[10].mxu1 %v5159_v61  ;;  %v5888_v61 = vand.u32 4294901760, %v5028_v18 }
 0x18c   :  { %3578 = vmatprep.mubr.f32.mxu1 %v5183_v10  ;;  %4131 = vmatpush3.bf16.msra.mxu1 %v4870_v15 }
 0x18d   :  { %4133 = vmatprep.subr.bf16.mxu1 %v4880_v23  ;;  %v4172_v10 = vpack.c.bf16 %v5888_v61, %v5887_v27 }
 0x18f   :  { %3579 = vmatmul.mubr.f32.gmra.mrb[12].mxu1 %v5177_v16  ;;  %v4176_v16 = vpack.c.bf16 %v5891_v38, %v5890_v36 }
 0x190   :  { %3581 = vmatprep.mubr.f32.mxu1 %v5203_v22  ;;  %4135 = vmatpush3.bf16.msra.mxu1 %v4880_v23  ;;  %v5892_v22 = vld [vmem:[#allocation3_spill] sm:$0xff] }
 0x191   :  { %4137 = vmatprep.subr.bf16.mxu1 %v4890_v43  ;;  %v5893_v41 = vand.u32 4294901760, %v5892_v22 }
 0x193   :  { %3582 = vmatmul.mubr.f32.gmra.mrb[14].mxu1 %v5197_v40  ;;  %v4180_v18 = vpack.c.bf16 %v5895_v33, %v5893_v41  ;;  %v5896_v40 = vld [vmem:[#allocation5_spill] sm:$0xff] }
 0x194   :  { %4139 = vmatpush3.bf16.msra.mxu1 %v4890_v43  ;;  %3616 = vmatprep.mubr.f32.mxu1 %v5872_v20  ;;  %v5897_v24 = vand.u32 4294901760, %v5896_v40 }
 0x195   :  { %4141 = vmatprep.subr.bf16.mxu1 %v4906_v48 }
 0x196   :  { %v4184_v14 = vpack.c.bf16 %v5899_v0, %v5897_v24 }
 0x198   :  { %4143 = vmatpush3.bf16.msra.mxu1 %v4906_v48 }
 0x199   :  { %4145 = vmatprep.subr.bf16.mxu1 %v4922_v53 }
 0x19c   :  { %4147 = vmatpush3.bf16.msra.mxu1 %v4922_v53 }
 0x19d   :  { %4149 = vmatprep.subr.bf16.mxu1 %v4942_v58 }
 0x1a0   :  { %4151 = vmatpush3.bf16.msra.mxu1 %v4942_v58 }
 0x1a1   :  { %4153 = vmatprep.subr.bf16.mxu1 %v4974_v3 }
 0x1a4   :  { %4155 = vmatpush3.bf16.msra.mxu1 %v4974_v3 }
 0x1a5   :  { %4157 = vmatprep.subr.bf16.mxu1 %v4156_v25 }
 0x1a7   :  { %3617 = vmatmul.mubr.f32.vlgmr.msra.gmra.mrb[8].mxu1 %v5877_v39 }
 0x1a8   :  { %3619 = vmatprep.mubr.f32.mxu1 %v5878_v4  ;;  %4159 = vmatpush3.bf16.msra.mxu1 %v4156_v25 }
 0x1a9   :  { %4161 = vmatprep.subr.bf16.mxu1 %v4160_v42 }
 0x1ab   :  { %3620 = vmatmul.mubr.f32.gmra.mrb[10].mxu1 %v5881_v30  ;;  %v1915_v30 = vld [vmem:[%s5805_s7 + $0x78] sm:$0xff] }
 0x1ac   :  { %3622 = vmatprep.mubr.f32.mxu1 %v5882_v6  ;;  %4163 = vmatpush3.bf16.msra.mxu1 %v4160_v42 }
 0x1ad   :  { %4165 = vmatprep.subr.bf16.mxu1 %v4164_v8 }
 0x1af   :  { %3623 = vmatmul.mubr.f32.gmra.mrb[12].mxu1 %v5885_v63 }
 0x1b0   :  { %3625 = vmatprep.mubr.f32.mxu1 %v5886_v26  ;;  %4167 = vmatpush3.bf16.msra.mxu1 %v4164_v8  ;;  %v1914_v8 = vld [vmem:[%s5805_s7 + $0x70] sm:$0xff] }
 0x1b1   :  { %4169 = vmatprep.subr.bf16.mxu1 %v4168_v29  ;;  %v1959_v50 = vand.u32 4294901760, %v1914_v8 }
 0x1b3   :  { %3626 = vmatmul.mubr.f32.gmra.mrb[14].mxu1 %v5889_v5  ;;  %v5496_v61 = vsub.f32 %v1914_v8, %v1959_v50 }
 0x1b4   :  { %4171 = vmatpush3.bf16.msra.mxu1 %v4168_v29  ;;  %3660 = vmatprep.mubr.f32.mxu1 %v5141_v54  ;;  %v1962_v29 = vand.u32 4294901760, %v1915_v30 }
 0x1b5   :  { %4173 = vmatprep.subr.bf16.mxu1 %v4172_v10 }
 0x1b8   :  { %4175 = vmatpush3.bf16.msra.mxu1 %v4172_v10  ;;  %v5498_v10 = vsub.f32 %v1915_v30, %v1962_v29 }
 0x1b9   :  { %4177 = vmatprep.subr.bf16.mxu1 %v4176_v16 }
 0x1ba   :  { %v5856_v22 = vand.u32 4294901760, %v5498_v10 }
 0x1bc   :  { %4179 = vmatpush3.bf16.msra.mxu1 %v4176_v16  ;;  %v5857_v16 = vand.u32 4294901760, %v5496_v61 }
 0x1bd   :  { %4181 = vmatprep.subr.bf16.mxu1 %v4180_v18 }
 0x1be   :  { %v2179_v33 = vsub.f32 %v5496_v61, %v5857_v16 }
 0x1c0   :  { %4183 = vmatpush3.bf16.msra.mxu1 %v4180_v18  ;;  %v2186_v18 = vsub.f32 %v5498_v10, %v5856_v22  ;;  %v2180_v35 = vand.u32 4294901760, %v2179_v33 }
 0x1c1   :  { %4185 = vmatprep.subr.bf16.mxu1 %v4184_v14 }
 0x1c2   :  { %v2187_v0 = vand.u32 4294901760, %v2186_v18 }
 0x1c4   :  { %4187 = vmatpush3.bf16.msra.mxu1 %v4184_v14  ;;  %v4280_v14 = vpack.c.bf16 %v2187_v0, %v2180_v35 }
 0x1c5   :  { %4189 = vmatprep.subr.bf16.mxu1 %v4806_v31 }
 0x1c7   :  { %3661 = vmatmul.mubr.f32.vlgmr.msra.gmra.mrb[8].mxu1 %v5139_v55 }
 0x1c8   :  { %3663 = vmatprep.mubr.f32.mxu1 %v5152_v56  ;;  %4191 = vmatpush3.bf16.msra.mxu1 %v4806_v31  ;;  %v1908_v31 = vld [vmem:[%s5805_s7 + $0x40] sm:$0xff] }
 0x1c9   :  { %4193 = vmatprep.subr.bf16.mxu1 %v4870_v15 }
 0x1cb   :  { %3664 = vmatmul.mubr.f32.gmra.mrb[10].mxu1 %v5149_v28 }
 0x1cc   :  { %3666 = vmatprep.mubr.f32.mxu1 %v5170_v12  ;;  %4195 = vmatpush3.bf16.msra.mxu1 %v4870_v15  ;;  %v1909_v15 = vld [vmem:[%s5805_s7 + $0x48] sm:$0xff] }
 0x1cd   :  { %4197 = vmatprep.subr.bf16.mxu1 %v4880_v23 }
 0x1cf   :  { %3667 = vmatmul.mubr.f32.gmra.mrb[12].mxu1 %v5167_v34 }
 0x1d0   :  { %3669 = vmatprep.mubr.f32.mxu1 %v5188_v19  ;;  %4199 = vmatpush3.bf16.msra.mxu1 %v4880_v23  ;;  %v1941_v23 = vand.u32 4294901760, %v1908_v31 }
 0x1d1   :  { %4201 = vmatprep.subr.bf16.mxu1 %v4890_v43 }
 0x1d3   :  { %3670 = vmatmul.mubr.f32.gmra.mrb[14].mxu1 %v5185_v51 }
 0x1d4   :  { %4203 = vmatpush3.bf16.msra.mxu1 %v4890_v43  ;;  %3704 = vmatprep.mubr.f32.mxu1 %v5141_v54  ;;  %v1944_v43 = vand.u32 4294901760, %v1909_v15 }
 0x1d5   :  { %4205 = vmatprep.subr.bf16.mxu1 %v4906_v48 }
 0x1d6   :  { %v5500_v5 = vpack.c.bf16 %v1944_v43, %v1941_v23 }
 0x1d8   :  { %4207 = vmatpush3.bf16.msra.mxu1 %v4906_v48  ;;  %v5448_v48 = vsub.f32 %v1908_v31, %v1941_v23  ;;  %v5901_v23 = vld [vmem:[#allocation8_spill] sm:$0xff] }
 0x1d9   :  { %4209 = vmatprep.subr.bf16.mxu1 %v4922_v53 }
 0x1da   :  { %v2136_v45 = vand.u32 4294901760, %v5448_v48 }
 0x1dc   :  { %4211 = vmatpush3.bf16.msra.mxu1 %v4922_v53  ;;  %v5450_v53 = vsub.f32 %v1909_v15, %v1944_v43  ;;  %v5900_v15 = vld [vmem:[#allocation7_spill] sm:$0xff] }
 0x1dd   :  { %4213 = vmatprep.subr.bf16.mxu1 %v4942_v58  ;;  %v4284_v43 = vpack.c.bf16 %v5901_v23, %v5900_v15 }
 0x1de   :  { %v5862_v46 = vand.u32 4294901760, %v5450_v53 }
 0x1e0   :  { %4215 = vmatpush3.bf16.msra.mxu1 %v4942_v58  ;;  %v1910_v58 = vld [vmem:[%s5805_s7 + $0x50] sm:$0xff] }
 0x1e1   :  { %4217 = vmatprep.subr.bf16.mxu1 %v4974_v3 }
 0x1e4   :  { %4219 = vmatpush3.bf16.msra.mxu1 %v4974_v3  ;;  %v1911_v3 = vld [vmem:[%s5805_s7 + $0x58] sm:$0xff] }
 0x1e5   :  { %4221 = vmatprep.subr.bf16.mxu1 %v5262_v32  ;;  %v1950_v54 = vand.u32 4294901760, %v1911_v3 }
 0x1e7   :  { %3705 = vmatmul.mubr.f32.vlgmr.msra.gmra.mrb[8].mxu1 %v5139_v55  ;;  %v1947_v55 = vand.u32 4294901760, %v1910_v58 }
 0x1e8   :  { %3707 = vmatprep.mubr.f32.mxu1 %v5152_v56  ;;  %4223 = vmatpush3.bf16.msra.mxu1 %v5262_v32  ;;  %v2144_v56 = vsub.f32 %v5450_v53, %v5862_v46 }
 0x1e9   :  { %4225 = vmatprep.subr.bf16.mxu1 %v5277_v2  ;;  %v5518_v40 = vpack.c.bf16 %v1950_v54, %v1947_v55 }
 0x1ea   :  { %v2145_v21 = vand.u32 4294901760, %v2144_v56  ;;  %v2966_v56 = vld [vmem:[%s5806_s5] ss:$0 sm:$0xff] }
 0x1eb   :  { %3708 = vmatmul.mubr.f32.gmra.mrb[10].mxu1 %v5149_v28  ;;  %v2137_v28 = vsub.f32 %v5448_v48, %v2136_v45 }
 0x1ec   :  { %3710 = vmatprep.mubr.f32.mxu1 %v5170_v12  ;;  %4227 = vmatpush3.bf16.msra.mxu1 %v5277_v2  ;;  %v5468_v12 = vsub.f32 %v1911_v3, %v1950_v54  ;;  %v5534_v3 = vpack.c.bf16 %v5450_v53, %v5448_v48 }
 0x1ed   :  { %4229 = vmatprep.subr.bf16.mxu1 %v5281_v13  ;;  %v2138_v20 = vand.u32 4294901760, %v2137_v28  ;;  %v5546_v28 = vpack.c.bf16 %v5498_v10, %v5496_v61 }
 0x1ee   :  { %v5860_v25 = vand.u32 4294901760, %v5468_v12 }
 0x1ef   :  { %3711 = vmatmul.mubr.f32.gmra.mrb[12].mxu1 %v5167_v34  ;;  %v5466_v34 = vsub.f32 %v1910_v58, %v1947_v55  ;;  %v4268_v42 = vpack.c.bf16 %v2145_v21, %v2138_v20  ;;  %v5528_v58 = vpack.c.bf16 %v1962_v29, %v1959_v50 }
 0x1f0   :  { %3713 = vmatprep.mubr.f32.mxu1 %v5188_v19  ;;  %4231 = vmatpush3.bf16.msra.mxu1 %v5281_v13  ;;  %v1913_v19 = vld [vmem:[%s5805_s7 + $0x68] sm:$0xff]  ;;  %v2158_v4 = vsub.f32 %v5468_v12, %v5860_v25 }
 0x1f1   :  { %4233 = vmatprep.subr.bf16.mxu1 %v5310_v11  ;;  %v5861_v1 = vand.u32 4294901760, %v5466_v34  ;;  %v1956_v62 = vand.u32 4294901760, %v1913_v19  ;;  %4269 = vmatprep.subr.bf16.mxu0 %v4268_v42  ;;  %v5538_v55 = vpack.c.bf16 %v5468_v12, %v5466_v34 }
 0x1f2   :  { %v2159_v7 = vand.u32 4294901760, %v2158_v4  ;;  %4271 = vmatpush3.bf16.msra.mxu0 %v4268_v42 }
 0x1f3   :  { %3714 = vmatmul.mubr.f32.gmra.mrb[14].mxu1 %v5185_v51  ;;  %v1912_v51 = vld [vmem:[%s5805_s7 + $0x60] sm:$0xff]  ;;  %v2151_v39 = vsub.f32 %v5466_v34, %v5861_v1  ;;  %v5486_v60 = vsub.f32 %v1913_v19, %v1956_v62 }
 0x1f4   :  { %4235 = vmatpush3.bf16.msra.mxu1 %v5310_v11  ;;  %v1953_v47 = vand.u32 4294901760, %v1912_v51  ;;  %v2967_v19 = vld [vmem:[%s5807_s6] ss:$0 sm:$0xff] }
 0x1f5   :  { %v2152_v6 = vand.u32 4294901760, %v2151_v39  ;;  %v5858_v26 = vand.u32 4294901760, %v5486_v60  ;;  %4237 = vmatprep.subr.bf16.mxu1 %v5500_v5  ;;  %v5914_v48 = vand.u32 4294901760, %v5486_v60 }
 0x1f6   :  { %v5484_v59 = vsub.f32 %v1912_v51, %v1953_v47  ;;  %v5522_v31 = vpack.c.bf16 %v1956_v62, %v1953_v47 }
 0x1f7   :  { %v4272_v27 = vpack.c.bf16 %v2159_v7, %v2152_v6  ;;  %v2172_v38 = vsub.f32 %v5486_v60, %v5858_v26 }
 0x1f8   :  { %v5859_v63 = vand.u32 4294901760, %v5484_v59  ;;  %4239 = vmatpush3.bf16.msra.mxu1 %v5500_v5  ;;  %v5542_v54 = vpack.c.bf16 %v5486_v60, %v5484_v59 }
 0x1f9   :  { %4273 = vmatprep.subr.bf16.mxu0 %v4272_v27  ;;  %v2173_v17 = vand.u32 4294901760, %v2172_v38  ;;  %4241 = vmatprep.subr.bf16.mxu1 %v5518_v40 }
 0x1fa   :  { %v2165_v36 = vsub.f32 %v5484_v59, %v5859_v63  ;;  %4275 = vmatpush3.bf16.msra.mxu0 %v4272_v27 }
 0x1fc   :  { %v2166_v41 = vand.u32 4294901760, %v2165_v36  ;;  %4243 = vmatpush3.bf16.msra.mxu1 %v5518_v40 }
 0x1fd   :  { %4245 = vmatprep.subr.bf16.mxu1 %v5522_v31 }
 0x1fe   :  { %v4276_v24 = vpack.c.bf16 %v2173_v17, %v2166_v41 }
 0x200   :  { %4277 = vmatprep.subr.bf16.mxu0 %v4276_v24  ;;  %4247 = vmatpush3.bf16.msra.mxu1 %v5522_v31 }
 0x201   :  { %4279 = vmatpush3.bf16.msra.mxu0 %v4276_v24  ;;  %4249 = vmatprep.subr.bf16.mxu1 %v5528_v58 }
 0x202   :  { %4281 = vmatprep.subr.bf16.mxu0 %v4280_v14 }
 0x204   :  { %4251 = vmatpush3.bf16.msra.mxu1 %v5528_v58 }
 0x205   :  { %4283 = vmatpush3.bf16.msra.mxu0 %v4280_v14 }
 0x206   :  { %4285 = vmatprep.subr.bf16.mxu0 %v4284_v43 }
 0x2ba   :  { %v3706_v51 = vpop.f32.mrb[8].mxu1 }
 0x2bb   :  { %v1870_v20 = vmul.f32 %v3706_v51, %v2966_v56  ;;  %v1816_v21 = vpop.f32.mrb[9].mxu1 }
 0x2bc   :  { %v1869_v47 = vmul.f32 %v2966_v56, %v1816_v21 }
 0x2bd   :  { %v1885_v62 = vadd.f32 %v2967_v19, %v1870_v20 }
 0x2be   :  { %v1884_v42 = vadd.f32 %v2967_v19, %v1869_v47  ;;  %v3709_v39 = vpop.f32.mrb[10].mxu1  ;;  %v5902_v47 = vld [vmem:[#allocation9_spill] sm:$0xff] }
 0x2bf   :  { %4548 = vtanh.f32 %v1885_v62  ;;  %v1872_v4 = vmul.f32 %v3709_v39, %v2966_v56  ;;  %v1828_v8 = vpop.f32.mrb[11].mxu1  ;;  %v5903_v62 = vld [vmem:[#allocation10_spill] sm:$0xff] }
 0x2c0   :  { %4550 = vtanh.f32 %v1884_v42  ;;  %v1871_v30 = vmul.f32 %v2966_v56, %v1828_v8  ;;  %v4288_v42 = vpack.c.bf16 %v5903_v62, %v5902_v47 }
 0x2c1   :  { %v1887_v6 = vadd.f32 %v2967_v19, %v1872_v4 }
 0x2c2   :  { %v1886_v7 = vadd.f32 %v2967_v19, %v1871_v30  ;;  %v3712_v50 = vpop.f32.mrb[12].mxu1 }
 0x2c3   :  { %4552 = vtanh.f32 %v1887_v6  ;;  %v1874_v29 = vmul.f32 %v3712_v50, %v2966_v56  ;;  %v1840_v27 = vpop.f32.mrb[13].mxu1  ;;  %v5904_v50 = vld [vmem:[#allocation11_spill] sm:$0xff] }
 0x2c4   :  { %4554 = vtanh.f32 %v1886_v7  ;;  %v1873_v36 = vmul.f32 %v2966_v56, %v1840_v27 }
 0x2c5   :  { %v1889_v38 = vadd.f32 %v2967_v19, %v1874_v29  ;;  %v4292_v29 = vpack.c.bf16 %v5289_v52, %v5904_v50  ;;  %v5910_v52 = vand.u32 4294901760, %v5450_v53 }
 0x2c6   :  { %v1888_v41 = vadd.f32 %v2967_v19, %v1873_v36  ;;  %v3715_v17 = vpop.f32.mrb[14].mxu1 }
 0x2c7   :  { %4556 = vtanh.f32 %v1889_v38  ;;  %v1876_v33 = vmul.f32 %v3715_v17, %v2966_v56  ;;  %v1852_v18 = vpop.f32.mrb[15].mxu1 }
 0x2c8   :  { %4558 = vtanh.f32 %v1888_v41  ;;  %v1875_v24 = vmul.f32 %v2966_v56, %v1852_v18 }
 0x2c9   :  { %v4549_v35 = vpop.eup %4548  ;;  %v1891_v0 = vadd.f32 %v2967_v19, %v1876_v33 }
 0x2ca   :  { %v4551_v14 = vpop.eup %4550  ;;  %v1890_v51 = vadd.f32 %v2967_v19, %v1875_v24  ;;  %v5554_v20 = vand.u32 4294901760, %v4549_v35 }
 0x2cb   :  { %4560 = vtanh.f32 %v1891_v0  ;;  %v5556_v21 = vand.u32 4294901760, %v4551_v14 }
 0x2cc   :  { %4562 = vtanh.f32 %v1890_v51  ;;  %v5561_v39 = vsub.f32 %v4549_v35, %v5554_v20  ;;  %v4296_v51 = vpack.c.bf16 %v5319_v37, %v5312_v9  ;;  %v5911_v9 = vand.u32 4294901760, %v5466_v34 }
 0x2cd   :  { %v4553_v4 = vpop.eup %4552  ;;  %3792 = vmatprep.mubr.f32.mxu0 %v5556_v21  ;;  %v5565_v56 = vsub.f32 %v4551_v14, %v5556_v21  ;;  %v5912_v37 = vand.u32 4294901760, %v5468_v12 }
 0x2ce   :  { %v4555_v8 = vpop.eup %4554  ;;  %3793 = vmatmul.mubr.f32.vlgmr.msra.gmra.mrb[8].mxu0 %v5554_v20  ;;  %v5568_v19 = vand.u32 4294901760, %v4553_v4  ;;  %v2009_v30 = vand.u32 4294901760, %v5561_v39 }
 0x2cf   :  { %4287 = vmatpush3.bf16.msra.mxu0 %v4284_v43  ;;  %v5571_v6 = vand.u32 4294901760, %v4555_v8  ;;  %v1999_v7 = vand.u32 4294901760, %v5565_v56 }
 0x2d0   :  { %4289 = vmatprep.subr.bf16.mxu0 %v4288_v42  ;;  %v2010_v27 = vsub.f32 %v5561_v39, %v2009_v30  ;;  %v5580_v36 = vsub.f32 %v4553_v4, %v5568_v19 }
 0x2d1   :  { %v4557_v38 = vpop.eup %4556  ;;  %3795 = vmatprep.mubr.f32.mxu0 %v5571_v6  ;;  %v2000_v43 = vsub.f32 %v5565_v56, %v1999_v7  ;;  %v5587_v41 = vsub.f32 %v4555_v8, %v5571_v6 }
 0x2d2   :  { %v4559_v17 = vpop.eup %4558  ;;  %3796 = vmatmul.mubr.f32.gmra.mrb[10].mxu0 %v5568_v19  ;;  %v5590_v33 = vand.u32 4294901760, %v4557_v38  ;;  %v2029_v18 = vand.u32 4294901760, %v5580_v36  ;;  %v2011_v14 = vand.u32 4294901760, %v2010_v27 }
 0x2d3   :  { %4291 = vmatpush3.bf16.msra.mxu0 %v4288_v42  ;;  %v2001_v24 = vand.u32 4294901760, %v2000_v43  ;;  %v5593_v35 = vand.u32 4294901760, %v4559_v17  ;;  %v2019_v0 = vand.u32 4294901760, %v5587_v41 }
 0x2d4   :  { %4293 = vmatprep.subr.bf16.mxu0 %v4292_v29  ;;  %v2030_v4 = vsub.f32 %v5580_v36, %v2029_v18  ;;  %v5602_v8 = vsub.f32 %v4557_v38, %v5590_v33 }
 0x2d5   :  { %v4561_v22 = vpop.eup %4560  ;;  %3748 = vmatprep.mubr.f32.mxu1 %v2001_v24  ;;  %3798 = vmatprep.mubr.f32.mxu0 %v5593_v35  ;;  %v2020_v42 = vsub.f32 %v5587_v41, %v2019_v0  ;;  %v5609_v27 = vsub.f32 %v4559_v17, %v5593_v35 }
 0x2d6   :  { %v4563_v43 = vpop.eup %4562  ;;  %3749 = vmatmul.mubr.f32.vlgmr.msra.gmra.mrb[16].mxu1 %v2011_v14  ;;  %3799 = vmatmul.mubr.f32.gmra.mrb[12].mxu0 %v5590_v33  ;;  %v5612_v16 = vand.u32 4294901760, %v4561_v22  ;;  %v2049_v38 = vand.u32 4294901760, %v5602_v8  ;;  %v2031_v25 = vand.u32 4294901760, %v2030_v4 }
 0x2d7   :  { %4295 = vmatpush3.bf16.msra.mxu0 %v4292_v29  ;;  %v2021_v26 = vand.u32 4294901760, %v2020_v42  ;;  %v5615_v24 = vand.u32 4294901760, %v4563_v43  ;;  %v2039_v63 = vand.u32 4294901760, %v5609_v27 }
 0x2d8   :  { %4297 = vmatprep.subr.bf16.mxu0 %v4296_v51  ;;  %v2050_v17 = vsub.f32 %v5602_v8, %v2049_v38  ;;  %v5622_v14 = vsub.f32 %v4561_v22, %v5612_v16 }
 0x2d9   :  { %3751 = vmatprep.mubr.f32.mxu1 %v2021_v26  ;;  %3801 = vmatprep.mubr.f32.mxu0 %v5615_v24  ;;  %v2040_v29 = vsub.f32 %v5609_v27, %v2039_v63  ;;  %v5629_v42 = vsub.f32 %v4563_v43, %v5615_v24 }
 0x2da   :  { %3752 = vmatmul.mubr.f32.gmra.mrb[18].mxu1 %v2031_v25  ;;  %3802 = vmatmul.mubr.f32.gmra.mrb[14].mxu0 %v5612_v16  ;;  %v2069_v4 = vand.u32 4294901760, %v5622_v14  ;;  %v2051_v1 = vand.u32 4294901760, %v2050_v17 }
 0x2db   :  { %4299 = vmatpush3.bf16.msra.mxu0 %v4296_v51  ;;  %3836 = vmatprep.mubr.f32.mxu0 %v5565_v56  ;;  %v2041_v22 = vand.u32 4294901760, %v2040_v29  ;;  %v2059_v26 = vand.u32 4294901760, %v5629_v42 }
 0x2dc   :  { %4301 = vmatprep.subr.bf16.mxu0 %v5534_v3  ;;  %v2070_v46 = vsub.f32 %v5622_v14, %v2069_v4 }
 0x2dd   :  { %3754 = vmatprep.mubr.f32.mxu1 %v2041_v22  ;;  %v2060_v25 = vsub.f32 %v5629_v42, %v2059_v26 }
 0x2de   :  { %3755 = vmatmul.mubr.f32.gmra.mrb[20].mxu1 %v2051_v1  ;;  %v2071_v51 = vand.u32 4294901760, %v2070_v46  ;;  %v5905_v46 = vand.u32 4294901760, %v5900_v15  ;;  %v5906_v1 = vand.u32 4294901760, %v5901_v23  ;;  %v5909_v15 = vand.u32 4294901760, %v5904_v50 }
 0x2df   :  { %4303 = vmatpush3.bf16.msra.mxu0 %v5534_v3  ;;  %v2061_v43 = vand.u32 4294901760, %v2060_v25 }
 0x2e0   :  { %4305 = vmatprep.subr.bf16.mxu0 %v5538_v55  ;;  %v4348_v3 = vpack.c.bf16 %v5906_v1, %v5905_v46  ;;  %v4356_v23 = vpack.c.bf16 %v2115_v49, %v5909_v15  ;;  %v4364_v49 = vpack.c.bf16 %v5910_v52, %v2136_v45  ;;  %v5915_v45 = vand.u32 4294901760, %v5496_v61 }
 0x2e1   :  { %3757 = vmatprep.mubr.f32.mxu1 %v2061_v43  ;;  %v17_v61 = vstv %s5808_s11 }
 0x2e2   :  { %3758 = vmatmul.mubr.f32.gmra.mrb[22].mxu1 %v2071_v51  ;;  %18 = vst [vmem:[#allocation2] sm:$0x1] %v17_v61 }
 0x2e3   :  { %4307 = vmatpush3.bf16.msra.mxu0 %v5538_v55  ;;  %v5907_v55 = vand.u32 4294901760, %v5902_v47  ;;  %v4360_v47 = vpack.c.bf16 %v2129_v44, %v2122_v57  ;;  %v4368_v57 = vpack.c.bf16 %v5912_v37, %v5911_v9  ;;  %v5913_v44 = vand.u32 4294901760, %v5484_v59 }
 0x2e4   :  { %4309 = vmatprep.subr.bf16.mxu0 %v5542_v54 }
 0x2e5   :  { %v4372_v53 = vpack.c.bf16 %v5914_v48, %v5913_v44 }
 0x2e7   :  { %4311 = vmatpush3.bf16.msra.mxu0 %v5542_v54  ;;  %v5908_v54 = vand.u32 4294901760, %v5903_v62 }
 0x2e8   :  { %4313 = vmatprep.subr.bf16.mxu0 %v5546_v28 }
 0x2eb   :  { %4315 = vmatpush3.bf16.msra.mxu0 %v5546_v28  ;;  %v4352_v28 = vpack.c.bf16 %v5908_v54, %v5907_v55 }
 0x2ec   :  { %4317 = vmatprep.subr.bf16.mxu0 %v5262_v32 }
 0x2ee   :  { %3837 = vmatmul.mubr.f32.vlgmr.msra.gmra.mrb[8].mxu0 %v5561_v39 }
 0x2ef   :  { %3839 = vmatprep.mubr.f32.mxu0 %v5587_v41  ;;  %4319 = vmatpush3.bf16.msra.mxu0 %v5262_v32 }
 0x2f0   :  { %4321 = vmatprep.subr.bf16.mxu0 %v5277_v2 }
 0x2f2   :  { %3840 = vmatmul.mubr.f32.gmra.mrb[10].mxu0 %v5580_v36 }
 0x2f3   :  { %3842 = vmatprep.mubr.f32.mxu0 %v5609_v27  ;;  %4323 = vmatpush3.bf16.msra.mxu0 %v5277_v2 }
 0x2f4   :  { %4325 = vmatprep.subr.bf16.mxu0 %v5281_v13 }
 0x2f6   :  { %3843 = vmatmul.mubr.f32.gmra.mrb[12].mxu0 %v5602_v8 }
 0x2f7   :  { %3845 = vmatprep.mubr.f32.mxu0 %v5629_v42  ;;  %4327 = vmatpush3.bf16.msra.mxu0 %v5281_v13 }
 0x2f8   :  { %4329 = vmatprep.subr.bf16.mxu0 %v5310_v11 }
 0x2fa   :  { %3846 = vmatmul.mubr.f32.gmra.mrb[14].mxu0 %v5622_v14 }
 0x2fb   :  { %4331 = vmatpush3.bf16.msra.mxu0 %v5310_v11  ;;  %3880 = vmatprep.mubr.f32.mxu0 %v1999_v7 }
 0x2fc   :  { %4333 = vmatprep.subr.bf16.mxu0 %v5500_v5 }
 0x2ff   :  { %4335 = vmatpush3.bf16.msra.mxu0 %v5500_v5 }
 0x300   :  { %4337 = vmatprep.subr.bf16.mxu0 %v5518_v40 }
 0x303   :  { %4339 = vmatpush3.bf16.msra.mxu0 %v5518_v40 }
 0x304   :  { %4341 = vmatprep.subr.bf16.mxu0 %v5522_v31 }
 0x307   :  { %4343 = vmatpush3.bf16.msra.mxu0 %v5522_v31 }
 0x308   :  { %4345 = vmatprep.subr.bf16.mxu0 %v5528_v58 }
 0x30b   :  { %4347 = vmatpush3.bf16.msra.mxu0 %v5528_v58 }
 0x30c   :  { %4349 = vmatprep.subr.bf16.mxu0 %v4348_v3 }
 0x30e   :  { %3881 = vmatmul.mubr.f32.vlgmr.msra.gmra.mrb[8].mxu0 %v2009_v30 }
 0x30f   :  { %3883 = vmatprep.mubr.f32.mxu0 %v2019_v0  ;;  %4351 = vmatpush3.bf16.msra.mxu0 %v4348_v3 }
 0x310   :  { %4353 = vmatprep.subr.bf16.mxu0 %v4352_v28 }
 0x312   :  { %3884 = vmatmul.mubr.f32.gmra.mrb[10].mxu0 %v2029_v18 }
 0x313   :  { %3886 = vmatprep.mubr.f32.mxu0 %v2039_v63  ;;  %4355 = vmatpush3.bf16.msra.mxu0 %v4352_v28  ;;  %v5916_v63 = vand.u32 4294901760, %v5498_v10 }
 0x314   :  { %4357 = vmatprep.subr.bf16.mxu0 %v4356_v23 }
 0x315   :  { %v4376_v62 = vpack.c.bf16 %v5916_v63, %v5915_v45 }
 0x316   :  { %3887 = vmatmul.mubr.f32.gmra.mrb[12].mxu0 %v2049_v38 }
 0x317   :  { %3889 = vmatprep.mubr.f32.mxu0 %v2059_v26  ;;  %4359 = vmatpush3.bf16.msra.mxu0 %v4356_v23  ;;  %v2970_v26 = vld [vmem:[%s5811_s10] ss:$0 sm:$0xff] }
 0x318   :  { %4361 = vmatprep.subr.bf16.mxu0 %v4360_v47 }
 0x31a   :  { %3890 = vmatmul.mubr.f32.gmra.mrb[14].mxu0 %v2069_v4 }
 0x31b   :  { %4363 = vmatpush3.bf16.msra.mxu0 %v4360_v47  ;;  %3924 = vmatprep.mubr.f32.mxu0 %v5556_v21 }
 0x31c   :  { %4365 = vmatprep.subr.bf16.mxu0 %v4364_v49 }
 0x31f   :  { %4367 = vmatpush3.bf16.msra.mxu0 %v4364_v49 }
 0x320   :  { %4369 = vmatprep.subr.bf16.mxu0 %v4368_v57 }
 0x323   :  { %4371 = vmatpush3.bf16.msra.mxu0 %v4368_v57 }
 0x324   :  { %4373 = vmatprep.subr.bf16.mxu0 %v4372_v53 }
 0x327   :  { %4375 = vmatpush3.bf16.msra.mxu0 %v4372_v53 }
 0x328   :  { %4377 = vmatprep.subr.bf16.mxu0 %v4376_v62 }
 0x32b   :  { %4379 = vmatpush3.bf16.msra.mxu0 %v4376_v62 }
 0x32c   :  { %4381 = vmatprep.subr.bf16.mxu0 %v5262_v32 }
 0x32e   :  { %3925 = vmatmul.mubr.f32.vlgmr.msra.gmra.mrb[8].mxu0 %v5554_v20 }
 0x32f   :  { %3927 = vmatprep.mubr.f32.mxu0 %v5571_v6  ;;  %4383 = vmatpush3.bf16.msra.mxu0 %v5262_v32 }
 0x330   :  { %4385 = vmatprep.subr.bf16.mxu0 %v5277_v2 }
 0x332   :  { %3928 = vmatmul.mubr.f32.gmra.mrb[10].mxu0 %v5568_v19 }
 0x333   :  { %3930 = vmatprep.mubr.f32.mxu0 %v5593_v35  ;;  %4387 = vmatpush3.bf16.msra.mxu0 %v5277_v2 }
 0x334   :  { %4389 = vmatprep.subr.bf16.mxu0 %v5281_v13 }
 0x336   :  { %3931 = vmatmul.mubr.f32.gmra.mrb[12].mxu0 %v5590_v33 }
 0x337   :  { %3933 = vmatprep.mubr.f32.mxu0 %v5615_v24  ;;  %4391 = vmatpush3.bf16.msra.mxu0 %v5281_v13 }
 0x338   :  { %4393 = vmatprep.subr.bf16.mxu0 %v5310_v11 }
 0x33a   :  { %3934 = vmatmul.mubr.f32.gmra.mrb[14].mxu0 %v5612_v16 }
 0x33b   :  { %4395 = vmatpush3.bf16.msra.mxu0 %v5310_v11  ;;  %3968 = vmatprep.mubr.f32.mxu0 %v5556_v21 }
 0x33c   :  { %4397 = vmatprep.subr.bf16.mxu0 %v5500_v5 }
 0x33f   :  { %4399 = vmatpush3.bf16.msra.mxu0 %v5500_v5  ;;  %v2968_v5 = vld [vmem:[%s5809_s8] ss:$0 sm:$0xff] }
 0x340   :  { %4401 = vmatprep.subr.bf16.mxu0 %v5518_v40 }
 0x343   :  { %4403 = vmatpush3.bf16.msra.mxu0 %v5518_v40 }
 0x344   :  { %4405 = vmatprep.subr.bf16.mxu0 %v5522_v31 }
 0x347   :  { %4407 = vmatpush3.bf16.msra.mxu0 %v5522_v31  ;;  %v2969_v31 = vld [vmem:[%s5810_s9] ss:$0 sm:$0xff] }
 0x348   :  { %4409 = vmatprep.subr.bf16.mxu0 %v5528_v58 }
 0x34b   :  { %4411 = vmatpush3.bf16.msra.mxu0 %v5528_v58 }
 0x34e   :  { %3969 = vmatmul.mubr.f32.vlgmr.msra.gmra.mrb[8].mxu0 %v5554_v20 }
 0x34f   :  { %3971 = vmatprep.mubr.f32.mxu0 %v5571_v6 }
 0x352   :  { %3972 = vmatmul.mubr.f32.gmra.mrb[10].mxu0 %v5568_v19 }
 0x353   :  { %3974 = vmatprep.mubr.f32.mxu0 %v5593_v35 }
 0x356   :  { %3975 = vmatmul.mubr.f32.gmra.mrb[12].mxu0 %v5590_v33 }
 0x357   :  { %3977 = vmatprep.mubr.f32.mxu0 %v5615_v24 }
 0x35a   :  { %3978 = vmatmul.mubr.f32.gmra.mrb[14].mxu0 %v5612_v16 }
 0x3a9   :  { %v3750_v11 = vpop.f32.mrb[16].mxu1 }
 0x3aa   :  { %v2003_v2 = vpop.f32.mrb[17].mxu1 }
 0x3ad   :  { %v3753_v32 = vpop.f32.mrb[18].mxu1 }
 0x3ae   :  { %v2023_v13 = vpop.f32.mrb[19].mxu1 }
 0x3b1   :  { %v3756_v34 = vpop.f32.mrb[20].mxu1 }
 0x3b2   :  { %v2043_v12 = vpop.f32.mrb[21].mxu1 }
 0x3b5   :  { %v3759_v59 = vpop.f32.mrb[22].mxu1 }
 0x3b6   :  { %v2063_v60 = vpop.f32.mrb[23].mxu1 }
 0x421   :  { %v3970_v10 = vpop.f32.mrb[8].mxu0 }
 0x422   :  { %v4420_v40 = vadd.f32 %v3970_v10, %v3750_v11  ;;  %v2812_v16 = vpop.f32.mrb[9].mxu0 }
 0x423   :  { %v4421_v58 = vadd.f32 %v2812_v16, %v2003_v2 }
 0x424   :  { %v2866_v20 = vmul.f32 %v4420_v40, %v2968_v5 }
 0x425   :  { %v2865_v21 = vmul.f32 %v4421_v58, %v2968_v5  ;;  %v3973_v39 = vpop.f32.mrb[10].mxu0 }
 0x426   :  { %v2881_v56 = vadd.f32 %v2969_v31, %v2866_v20  ;;  %v4422_v19 = vadd.f32 %v3973_v39, %v3753_v32  ;;  %v2824_v30 = vpop.f32.mrb[11].mxu0 }
 0x427   :  { %v2880_v6 = vadd.f32 %v2969_v31, %v2865_v21  ;;  %v4423_v7 = vadd.f32 %v2824_v30, %v2023_v13 }
 0x428   :  { %4564 = vtanh.f32 %v2881_v56  ;;  %v2868_v50 = vmul.f32 %v4422_v19, %v2968_v5 }
 0x429   :  { %4566 = vtanh.f32 %v2880_v6  ;;  %v2867_v36 = vmul.f32 %v4423_v7, %v2968_v5  ;;  %v3976_v41 = vpop.f32.mrb[12].mxu0 }
 0x42a   :  { %v2883_v33 = vadd.f32 %v2969_v31, %v2868_v50  ;;  %v4424_v18 = vadd.f32 %v3976_v41, %v3756_v34  ;;  %v2836_v35 = vpop.f32.mrb[13].mxu0  ;;  %v2971_v34 = vld [vmem:[#allocation2] ss:$0 sm:$0xff] }
 0x42b   :  { %v2882_v0 = vadd.f32 %v2969_v31, %v2867_v36  ;;  %v4425_v8 = vadd.f32 %v2836_v35, %v2043_v12 }
 0x42c   :  { %4568 = vtanh.f32 %v2883_v33  ;;  %v2870_v27 = vmul.f32 %v4424_v18, %v2968_v5 }
 0x42d   :  { %4570 = vtanh.f32 %v2882_v0  ;;  %v2869_v38 = vmul.f32 %v4425_v8, %v2968_v5  ;;  %v3979_v24 = vpop.f32.mrb[14].mxu0 }
 0x42e   :  { %v2885_v17 = vadd.f32 %v2969_v31, %v2870_v27  ;;  %v4426_v14 = vadd.f32 %v3979_v24, %v3759_v59  ;;  %v2848_v29 = vpop.f32.mrb[15].mxu0 }
 0x42f   :  { %v2884_v42 = vadd.f32 %v2969_v31, %v2869_v38  ;;  %v4427_v4 = vadd.f32 %v2848_v29, %v2063_v60 }
 0x430   :  { %4572 = vtanh.f32 %v2885_v17  ;;  %v2872_v22 = vmul.f32 %v4426_v14, %v2968_v5 }
 0x431   :  { %4574 = vtanh.f32 %v2884_v42  ;;  %v2871_v25 = vmul.f32 %v4427_v4, %v2968_v5 }
 0x432   :  { %v4565_v43 = vpop.eup %4564  ;;  %v2887_v51 = vadd.f32 %v2969_v31, %v2872_v22 }
 0x433   :  { %v4567_v46 = vpop.eup %4566  ;;  %v2886_v1 = vadd.f32 %v2969_v31, %v2871_v25  ;;  %v2904_v3 = vmul.f32 %v4565_v43, %v2970_v26 }
 0x434   :  { %4576 = vtanh.f32 %v2887_v51  ;;  %v2903_v54 = vmul.f32 %v4567_v46, %v2970_v26 }
 0x435   :  { %4578 = vtanh.f32 %v2886_v1  ;;  %v2915_v55 = vsel %vm2911_vm1, %v2904_v3, 0.0 }
 0x436   :  { %v4569_v28 = vpop.eup %4568  ;;  %2916 = vadd.xlane.f32.xlu0 %v2915_v55  ;;  %v2912_v52 = vsel %vm2911_vm1, %v2903_v54, 0.0 }
 0x437   :  { %v4571_v15 = vpop.eup %4570  ;;  %v2906_v23 = vmul.f32 %v4569_v28, %v2970_v26 }
 0x438   :  { %v2905_v49 = vmul.f32 %v4571_v15, %v2970_v26 }
 0x439   :  { %v2921_v47 = vsel %vm2911_vm1, %v2906_v23, 0.0 }
 0x43a   :  { %v4573_v9 = vpop.eup %4572  ;;  %2922 = vadd.xlane.f32.xlu1 %v2921_v47  ;;  %2913 = vadd.xlane.f32.xlu0 %v2912_v52  ;;  %v2918_v44 = vsel %vm2911_vm1, %v2905_v49, 0.0 }
 0x43b   :  { %v4575_v37 = vpop.eup %4574  ;;  %v2908_v48 = vmul.f32 %v4573_v9, %v2970_v26 }
 0x43c   :  { %v2907_v57 = vmul.f32 %v4575_v37, %v2970_v26 }
 0x43d   :  { %v2927_v11 = vsel %vm2911_vm1, %v2908_v48, 0.0 }
 0x43e   :  { %v4577_v53 = vpop.eup %4576  ;;  %2919 = vadd.xlane.f32.xlu1 %v2918_v44  ;;  %v2924_v45 = vsel %vm2911_vm1, %v2907_v57, 0.0 }
 0x43f   :  { %v4579_v63 = vpop.eup %4578  ;;  %2925 = vadd.xlane.f32.xlu0 %v2924_v45  ;;  %v2910_v2 = vmul.f32 %v4577_v53, %v2970_v26 }
 0x440   :  { %v2909_v62 = vmul.f32 %v4579_v63, %v2970_v26 }
 0x441   :  { %v2933_v13 = vsel %vm2911_vm1, %v2910_v2, 0.0 }
 0x442   :  { %2928 = vadd.xlane.f32.xlu1 %v2927_v11  ;;  %v2930_v32 = vsel %vm2911_vm1, %v2909_v62, 0.0 }
 0x443   :  { %2931 = vadd.xlane.f32.xlu0 %v2930_v32 }
 0x446   :  { %2934 = vadd.xlane.f32.xlu1 %v2933_v13 }
 0x4c3   :  { %v2917_v12 = vpop.xlane.xlu0 %2916 }
 0x4c4   :  { %v2944_v59 = vadd.f32 %v2971_v34, %v2917_v12 }
 0x4c6   :  { %2953 = vst.msk [vmem:[%s5812_s12 + $0x8] sm:$0xff] %vm2951_vm2, %v2944_v59 }
 0x4c7   :  { %v2923_v60 = vpop.xlane.xlu1 %2922  ;;  %v2914_v61 = vpop.xlane.xlu0 %2913 }
 0x4c8   :  { %v2946_v10 = vadd.f32 %v2971_v34, %v2923_v60  ;;  %v2943_v5 = vadd.f32 %v2971_v34, %v2914_v61 }
 0x4ca   :  { %2955 = vst.msk [vmem:[%s5812_s12 + $0x18] sm:$0xff] %vm2951_vm2, %v2946_v10  ;;  %2952 = vst.msk [vmem:[%s5812_s12] sm:$0xff] %vm2951_vm2, %v2943_v5 }
 0x4cb   :  { %v2920_v40 = vpop.xlane.xlu1 %2919 }
 0x4cc   :  { %v2945_v16 = vadd.f32 %v2971_v34, %v2920_v40  ;;  %v2926_v31 = vpop.xlane.xlu0 %2925 }
 0x4cd   :  { %v2947_v58 = vadd.f32 %v2971_v34, %v2926_v31 }
 0x4ce   :  { %2954 = vst.msk [vmem:[%s5812_s12 + $0x10] sm:$0xff] %vm2951_vm2, %v2945_v16 }
 0x4cf   :  { %2956 = vst.msk [vmem:[%s5812_s12 + $0x20] sm:$0xff] %vm2951_vm2, %v2947_v58  ;;  %v2929_v20 = vpop.xlane.xlu1 %2928 }
 0x4d0   :  { %v2948_v21 = vadd.f32 %v2971_v34, %v2929_v20  ;;  %v2932_v39 = vpop.xlane.xlu0 %2931 }
 0x4d1   :  { %v2949_v56 = vadd.f32 %v2971_v34, %v2932_v39 }
 0x4d2   :  { %2957 = vst.msk [vmem:[%s5812_s12 + $0x28] sm:$0xff] %vm2951_vm2, %v2948_v21 }
 0x4d3   :  { %2958 = vst.msk [vmem:[%s5812_s12 + $0x30] sm:$0xff] %vm2951_vm2, %v2949_v56  ;;  %v2935_v19 = vpop.xlane.xlu1 %2934 }
 0x4d4   :  { %v2950_v30 = vadd.f32 %v2971_v34, %v2935_v19 }
 0x4d6   :  { %2959 = vst.msk [vmem:[%s5812_s12 + $0x38] sm:$0xff] %vm2951_vm2, %v2950_v30 }

</bundles_post_ra>
